<compile_context>
chip_gen: v7x
topology: tpu7x:2x2x1
jax: 0.10.0
libtpu: 0.0.40
codegen_flags: <defaults>
</compile_context>

<pallas_src>
import functools

import jax
import jax.numpy as jnp
import numpy as np
from jax.experimental import pallas as pl
from jax.experimental.pallas import tpu as pltpu

HIDDEN = 32
EDGE_DIM = 3
LN_EPS = 1e-5


def _message_layer_kernel(
    # per-edge-tile streamed inputs
    src_col_ref, tgt_col_ref, tgt_row_ref, eb_ref,
    # resident node data (constant index maps)
    xs_ref, xt_ref, x_ref,
    # packed resident weights
    wmsg_ref, wupd_ref, bias_ref,
    # output
    out_ref,
    # scratch
    agg_ref,
):
    k = pl.program_id(0)
    nk = pl.num_programs(0)
    dot = functools.partial(jnp.dot, preferred_element_type=jnp.float32)

    n_all, h = x_ref.shape
    tile_e = src_col_ref.shape[0]

    # ---- init: zero the full-node aggregator once ----
    @pl.when(k == 0)
    def _init():
        agg_ref[...] = jnp.zeros_like(agg_ref)

    # ---- message MLP for this edge tile (computed exactly once per edge) ----
    # Gather-as-matmul: exact 0/1 one-hots built in-register from int32 edge ids.
    # (Dropout layers are identity in eval mode.)
    node_iota = jax.lax.broadcasted_iota(jnp.int32, (tile_e, n_all), 1)
    oh_src = (src_col_ref[...] == node_iota).astype(jnp.float32)      # [TE, N]
    oh_tgt = (tgt_col_ref[...] == node_iota).astype(jnp.float32)      # [TE, N]

    wmsg = wmsg_ref[...]                # [2H, H]  = [w2 ; w3]
    bias = bias_ref[...]                # [5, 2H]
    w2 = wmsg[:h]
    w3 = wmsg[h:]
    b2 = bias[0:1, :h]
    b3 = bias[0:1, h:]

    # First message layer fused into the gather: oh_src@(x@Ws) + oh_tgt@(x@Wt)
    # + (edge_attr@We + b1)  — the latter two precomputed in the wrapper.
    hid = dot(oh_src, xs_ref[...]) + dot(oh_tgt, xt_ref[...]) + eb_ref[...]
    hid = jnp.maximum(hid, 0.0)
    hid = jnp.maximum(dot(hid, w2) + b2, 0.0)
    messages = dot(hid, w3) + b3                                      # [TE, H]

    # ---- scatter-add over targets (torch.index_add), MXU reduction ----
    # Padded edges carry target -1, which never matches a row -> dropped.
    rows = jax.lax.broadcasted_iota(jnp.int32, (n_all, tile_e), 0)
    scat = (rows == tgt_row_ref[...]).astype(jnp.float32)             # [N, TE]
    agg_ref[...] += dot(scat, messages)

    # ---- gated node update + LayerNorm, once, after the last edge tile ----
    @pl.when(k == nk - 1)
    def _finish():
        x_all = x_ref[...]
        agg = agg_ref[...]
        wupd = wupd_ref[...]            # [5H, 2H]
        wx_gu = wupd[0:h]               # x-half of packed gate/update layer-1
        wa_gu = wupd[h:2 * h]           # agg-half
        w2_gu = wupd[2 * h:4 * h]       # block-diag(wg2, wu2)  [2H, 2H]
        wu3 = wupd[4 * h:5 * h, :h]     # [H, H]
        b_gu = bias[1:2, :]
        b2_gu = bias[2:3, :]
        bu3 = bias[3:4, :h]
        gamma = bias[4:5, :h]
        beta = bias[4:5, h:]

        # gate-1 / update-1 output-packed -> one [N,2H] activation
        pre = jnp.maximum(dot(x_all, wx_gu) + dot(agg, wa_gu) + b_gu, 0.0)
        # gate-2 / update-2 packed block-diagonally -> one [N,2H]@[2H,2H] matmul
        pre2 = dot(pre, w2_gu) + b2_gu
        gate = jax.nn.sigmoid(pre2[:, :h])
        u2 = jnp.maximum(pre2[:, h:], 0.0)
        upd = dot(u2, wu3) + bu3

        out = gate * upd + (1.0 - gate) * x_all

        mean = jnp.mean(out, axis=-1, keepdims=True)
        var = jnp.mean(jnp.square(out - mean), axis=-1, keepdims=True)
        normed = (out - mean) * jax.lax.rsqrt(var + LN_EPS)
        out_ref[...] = normed * gamma + beta


def init_params(key, h=HIDDEN, edge_dim=EDGE_DIM):
    """Deterministic PyTorch-style Linear init (U(-1/sqrt(fan_in), ...))."""
    def lin(k, fan_in, fan_out):
        k1, k2 = jax.random.split(k)
        bound = 1.0 / np.sqrt(fan_in)
        w = jax.random.uniform(k1, (fan_in, fan_out), jnp.float32, -bound, bound)
        b = jax.random.uniform(k2, (1, fan_out), jnp.float32, -bound, bound)
        return w, b

    keys = jax.random.split(key, 8)
    w1, b1 = lin(keys[0], 2 * h + edge_dim, h)     # message_mlp[0]
    w2, b2 = lin(keys[1], h, h)                    # message_mlp[3]
    w3, b3 = lin(keys[2], h, h)                    # message_mlp[6]
    wg1, bg1 = lin(keys[3], 2 * h, h)              # update_gate[0]
    wg2, bg2 = lin(keys[4], h, h)                  # update_gate[2]
    wu1, bu1 = lin(keys[5], 2 * h, h)              # update_mlp[0]
    wu2, bu2 = lin(keys[6], h, h)                  # update_mlp[3]
    wu3, bu3 = lin(keys[7], h, h)                  # update_mlp[5]
    return dict(
        w1=w1, b1=b1, ws=w1[:h], wt=w1[h:2 * h], we=w1[2 * h:],
        w2=w2, b2=b2, w3=w3, b3=b3,
        wg1=wg1, bg1=bg1, wg2=wg2, bg2=bg2,
        wu1=wu1, bu1=bu1, wu2=wu2, bu2=bu2, wu3=wu3, bu3=bu3,
        gamma=jnp.ones((1, h), jnp.float32), beta=jnp.zeros((1, h), jnp.float32),
    )


def enhanced_message_layer(x, edge_index, edge_attr, p, *, tile_e=512,
                           vmem_limit_bytes=32 * 1024 * 1024):
    """x: [N, H] f32, edge_index: [2, E] int32, edge_attr: [E, 3] f32."""
    N, H = x.shape
    E = edge_index.shape[1]

    n_pad = (-N) % 8                      # sublane alignment for node buffers
    e_pad = (-E) % tile_e
    Np, Ep = N + n_pad, E + e_pad

    x_p = jnp.pad(x.astype(jnp.float32), ((0, n_pad), (0, 0)))
    src = jnp.pad(edge_index[0].astype(jnp.int32), (0, e_pad))
    # padded edges target node -1 -> never scatter, results discarded
    tgt = jnp.pad(edge_index[1].astype(jnp.int32), (0, e_pad), constant_values=-1)
    src_col = src.reshape(Ep, 1)
    tgt_col = tgt.reshape(Ep, 1)
    tgt_row = tgt.reshape(1, Ep)

    # ---- one-off precompute in plain XLA (not redone inside the kernel) ----
    xs = x_p @ p["ws"]                                        # [Np, H]
    xt = x_p @ p["wt"]                                        # [Np, H]
    ea = jnp.pad(edge_attr.astype(jnp.float32), ((0, e_pad), (0, 0)))
    eb = ea @ p["we"] + p["b1"]                               # [Ep, H]

    # ---- pack the many small weights/biases into 3 slabs ----
    wmsg = jnp.concatenate([p["w2"], p["w3"]], axis=0)        # [2H, H]
    w1_gu = jnp.concatenate([p["wg1"], p["wu1"]], axis=1)     # [2H, 2H]
    w2_gu = (jnp.zeros((2 * H, 2 * H), jnp.float32)
             .at[:H, :H].set(p["wg2"]).at[H:, H:].set(p["wu2"]))
    wu3_pad = jnp.pad(p["wu3"], ((0, 0), (0, H)))             # [H, 2H]
    wupd = jnp.concatenate([w1_gu, w2_gu, wu3_pad], axis=0)   # [5H, 2H]
    bias = jnp.concatenate([
        jnp.concatenate([p["b2"], p["b3"]], axis=1),
        jnp.concatenate([p["bg1"], p["bu1"]], axis=1),
        jnp.concatenate([p["bg2"], p["bu2"]], axis=1),
        jnp.concatenate([p["bu3"], jnp.zeros((1, H), jnp.float32)], axis=1),
        jnp.concatenate([p["gamma"], p["beta"]], axis=1),
    ], axis=0)                                                # [5, 2H]

    grid = (Ep // tile_e,)

    edge_specs = [
        pl.BlockSpec((tile_e, 1), lambda k: (k, 0)),          # src_col
        pl.BlockSpec((tile_e, 1), lambda k: (k, 0)),          # tgt_col
        pl.BlockSpec((1, tile_e), lambda k: (0, k)),          # tgt_row
        pl.BlockSpec((tile_e, H), lambda k: (k, 0)),          # eb
    ]
    resident = [xs, xt, x_p, wmsg, wupd, bias]
    resident_specs = [pl.BlockSpec(tuple(a.shape), lambda k: (0, 0))
                      for a in resident]

    grid_spec = pltpu.PrefetchScalarGridSpec(
        num_scalar_prefetch=0,
        grid=grid,
        in_specs=edge_specs + resident_specs,
        out_specs=pl.BlockSpec((Np, H), lambda k: (0, 0)),
        scratch_shapes=[pltpu.VMEM((Np, H), jnp.float32)],    # agg accumulator
    )

    out = pl.pallas_call(
        _message_layer_kernel,
        out_shape=jax.ShapeDtypeStruct((Np, H), jnp.float32),
        grid_spec=grid_spec,
        compiler_params=pltpu.CompilerParams(
            dimension_semantics=("arbitrary",),
            vmem_limit_bytes=vmem_limit_bytes),
    )(src_col, tgt_col, tgt_row, eb, *resident)

    return out[:N]


def reference(x, edge_index, edge_attr, p):
    """Pure-JAX mirror of the PyTorch forward (eval mode)."""
    relu = jax.nn.relu
    src = x[edge_index[0]]
    tgt = x[edge_index[1]]
    mi = jnp.concatenate([src, tgt, edge_attr], axis=-1)
    h = relu(mi @ p["w1"] + p["b1"])
    h = relu(h @ p["w2"] + p["b2"])
    messages = h @ p["w3"] + p["b3"]
    agg = jnp.zeros_like(x).at[edge_index[1]].add(messages)
    ui = jnp.concatenate([x, agg], axis=-1)
    gate = jax.nn.sigmoid(relu(ui @ p["wg1"] + p["bg1"]) @ p["wg2"] + p["bg2"])
    u = relu(ui @ p["wu1"] + p["bu1"])
    u = relu(u @ p["wu2"] + p["bu2"])
    upd = u @ p["wu3"] + p["bu3"]
    out = gate * upd + (1.0 - gate) * x
    mean = jnp.mean(out, axis=-1, keepdims=True)
    var = jnp.mean(jnp.square(out - mean), axis=-1, keepdims=True)
    return (out - mean) * jax.lax.rsqrt(var + LN_EPS) * p["gamma"] + p["beta"]


if __name__ == "__main__":
    key = jax.random.PRNGKey(0)
    k_x, k_ei, k_ea, k_p = jax.random.split(key, 4)

    N, E, H = 64, 256, HIDDEN
    x = jax.random.normal(k_x, (N, H), jnp.float32)
    edge_index = jax.random.randint(k_ei, (2, E), 0, N, jnp.int32)
    edge_attr = jax.random.normal(k_ea, (E, EDGE_DIM), jnp.float32)
    params = init_params(k_p)

    # tile_e=128 -> grid (2,) so the multi-edge-tile accumulation path is tested
    out = enhanced_message_layer(x, edge_index, edge_attr, params, tile_e=128)
    out = jax.block_until_ready(out)

    ref = jax.block_until_ready(reference(x, edge_index, edge_attr, params))
    np.testing.assert_allclose(np.asarray(out), np.asarray(ref),
                               rtol=5e-4, atol=5e-4)

    print("KERNEL_OK")
</pallas_src>

<mosaic_0001>
module attributes {stable_mosaic.version = 11 : i64} {
  func.func @_message_layer_kernel(%arg0: i32, %arg1: memref<128x1xi32, #tpu.memory_space<vmem>>, %arg2: memref<128x1xi32, #tpu.memory_space<vmem>>, %arg3: memref<1x128xi32, #tpu.memory_space<vmem>>, %arg4: memref<128x32xf32, #tpu.memory_space<vmem>>, %arg5: memref<64x32xf32, #tpu.memory_space<vmem>>, %arg6: memref<64x32xf32, #tpu.memory_space<vmem>>, %arg7: memref<64x32xf32, #tpu.memory_space<vmem>>, %arg8: memref<64x32xf32, #tpu.memory_space<vmem>>, %arg9: memref<160x64xf32, #tpu.memory_space<vmem>>, %arg10: memref<5x64xf32, #tpu.memory_space<vmem>>, %arg11: memref<64x32xf32, #tpu.memory_space<vmem>>, %arg12: memref<64x32xf32, #tpu.memory_space<vmem>>) attributes {dimension_semantics = [#tpu.dimension_semantics<arbitrary>], iteration_bounds = array<i64: 2>, scalar_prefetch = 0 : i64, scratch_operands = 1 : i64, tpu.core_type = #tpu.core_type<tc>, window_params = [{transform_indices = @transform_0, window_bounds = array<i64: 128, 1>}, {transform_indices = @transform_1, window_bounds = array<i64: 128, 1>}, {transform_indices = @transform_2, window_bounds = array<i64: 1, 128>}, {transform_indices = @transform_3, window_bounds = array<i64: 128, 32>}, {pipeline_mode = #tpu.pipeline_mode<synchronous>, transform_indices = @transform_4, window_bounds = array<i64: 64, 32>}, {pipeline_mode = #tpu.pipeline_mode<synchronous>, transform_indices = @transform_5, window_bounds = array<i64: 64, 32>}, {pipeline_mode = #tpu.pipeline_mode<synchronous>, transform_indices = @transform_6, window_bounds = array<i64: 64, 32>}, {pipeline_mode = #tpu.pipeline_mode<synchronous>, transform_indices = @transform_7, window_bounds = array<i64: 64, 32>}, {pipeline_mode = #tpu.pipeline_mode<synchronous>, transform_indices = @transform_8, window_bounds = array<i64: 160, 64>}, {pipeline_mode = #tpu.pipeline_mode<synchronous>, transform_indices = @transform_9, window_bounds = array<i64: 5, 64>}, {pipeline_mode = #tpu.pipeline_mode<synchronous>, transform_indices = @transform_10, window_bounds = array<i64: 64, 32>}]} {
    %c0_i32 = arith.constant 0 : i32
    %0 = arith.cmpi eq, %arg0, %c0_i32 : i32
    %1 = arith.extui %0 : i1 to i32
    %c0_i32_0 = arith.constant 0 : i32
    %2 = arith.cmpi ne, %1, %c0_i32_0 : i32
    scf.if %2 {
      %cst_27 = arith.constant 0.000000e+00 : f32
      %50 = vector.broadcast %cst_27 : f32 to vector<64x32xf32>
      %c0_28 = arith.constant 0 : index
      %c0_29 = arith.constant 0 : index
      %51 = vector.load %arg12[%c0_28, %c0_29] : memref<64x32xf32, #tpu.memory_space<vmem>>, vector<64x32xf32>
      tpu.vector_store %arg12[%c0_28, %c0_29], %50 {strides = array<i32>} : memref<64x32xf32, #tpu.memory_space<vmem>>, vector<64x32xf32>,
    } else {
    }
    %3 = tpu.iota {dimensions = array<i32: 1>} : vector<128x64xi32>
    %c0 = arith.constant 0 : index
    %c0_1 = arith.constant 0 : index
    %4 = vector.load %arg1[%c0, %c0_1] : memref<128x1xi32, #tpu.memory_space<vmem>>, vector<128x1xi32>
    %5 = vector.broadcast %4 : vector<128x1xi32> to vector<128x64xi32>
    %6 = arith.cmpi eq, %5, %3 : vector<128x64xi32>
    %7 = arith.extui %6 : vector<128x64xi1> to vector<128x64xi32>
    %8 = arith.sitofp %7 : vector<128x64xi32> to vector<128x64xf32>
    %c0_2 = arith.constant 0 : index
    %c0_3 = arith.constant 0 : index
    %9 = vector.load %arg2[%c0_2, %c0_3] : memref<128x1xi32, #tpu.memory_space<vmem>>, vector<128x1xi32>
    %10 = vector.broadcast %9 : vector<128x1xi32> to vector<128x64xi32>
    %11 = arith.cmpi eq, %10, %3 : vector<128x64xi32>
    %12 = arith.extui %11 : vector<128x64xi1> to vector<128x64xi32>
    %13 = arith.sitofp %12 : vector<128x64xi32> to vector<128x64xf32>
    %c0_4 = arith.constant 0 : index
    %c0_5 = arith.constant 0 : index
    %14 = vector.load %arg8[%c0_4, %c0_5] : memref<64x32xf32, #tpu.memory_space<vmem>>, vector<64x32xf32>
    %c0_6 = arith.constant 0 : index
    %c0_7 = arith.constant 0 : index
    %15 = vector.load %arg10[%c0_6, %c0_7] : memref<5x64xf32, #tpu.memory_space<vmem>>, vector<5x64xf32>
    %16 = vector.extract_strided_slice %14 {offsets = [0, 0], sizes = [32, 32], strides = [1, 1]} : vector<64x32xf32> to vector<32x32xf32>
    %17 = vector.extract_strided_slice %14 {offsets = [32, 0], sizes = [32, 32], strides = [1, 1]} : vector<64x32xf32> to vector<32x32xf32>
    %18 = vector.extract_strided_slice %15 {offsets = [0, 0], sizes = [1, 32], strides = [1, 1]} : vector<5x64xf32> to vector<1x32xf32>
    %19 = vector.extract_strided_slice %15 {offsets = [0, 32], sizes = [1, 32], strides = [1, 1]} : vector<5x64xf32> to vector<1x32xf32>
    %c0_8 = arith.constant 0 : index
    %c0_9 = arith.constant 0 : index
    %20 = vector.load %arg5[%c0_8, %c0_9] : memref<64x32xf32, #tpu.memory_space<vmem>>, vector<64x32xf32>
    %cst = arith.constant dense<0.000000e+00> : vector<128x32xf32>
    %21 = tpu.matmul %8, %20, %cst {dimension_numbers = #tpu.dot_dimension_numbers<[1], [0], [0], [1], [0, 0, 1, 1], [], []>} : vector<128x64xf32>, vector<64x32xf32>, vector<128x32xf32> -> vector<128x32xf32>
    %c0_10 = arith.constant 0 : index
    %c0_11 = arith.constant 0 : index
    %22 = vector.load %arg6[%c0_10, %c0_11] : memref<64x32xf32, #tpu.memory_space<vmem>>, vector<64x32xf32>
    %cst_12 = arith.constant dense<0.000000e+00> : vector<128x32xf32>
    %23 = tpu.matmul %13, %22, %cst_12 {dimension_numbers = #tpu.dot_dimension_numbers<[1], [0], [0], [1], [0, 0, 1, 1], [], []>} : vector<128x64xf32>, vector<64x32xf32>, vector<128x32xf32> -> vector<128x32xf32>
    %24 = arith.addf %21, %23 : vector<128x32xf32>
    %c0_13 = arith.constant 0 : index
    %c0_14 = arith.constant 0 : index
    %25 = vector.load %arg4[%c0_13, %c0_14] : memref<128x32xf32, #tpu.memory_space<vmem>>, vector<128x32xf32>
    %26 = arith.addf %24, %25 : vector<128x32xf32>
    %cst_15 = arith.constant 0.000000e+00 : f32
    %27 = vector.broadcast %cst_15 : f32 to vector<128x32xf32>
    %28 = arith.maximumf %26, %27 : vector<128x32xf32>
    %cst_16 = arith.constant dense<0.000000e+00> : vector<128x32xf32>
    %29 = tpu.matmul %28, %16, %cst_16 {dimension_numbers = #tpu.dot_dimension_numbers<[1], [0], [0], [1], [0, 0, 1, 1], [], []>} : vector<128x32xf32>, vector<32x32xf32>, vector<128x32xf32> -> vector<128x32xf32>
    %30 = vector.broadcast %18 : vector<1x32xf32> to vector<128x32xf32>
    %31 = arith.addf %29, %30 : vector<128x32xf32>
    %cst_17 = arith.constant 0.000000e+00 : f32
    %32 = vector.broadcast %cst_17 : f32 to vector<128x32xf32>
    %33 = arith.maximumf %31, %32 : vector<128x32xf32>
    %cst_18 = arith.constant dense<0.000000e+00> : vector<128x32xf32>
    %34 = tpu.matmul %33, %17, %cst_18 {dimension_numbers = #tpu.dot_dimension_numbers<[1], [0], [0], [1], [0, 0, 1, 1], [], []>} : vector<128x32xf32>, vector<32x32xf32>, vector<128x32xf32> -> vector<128x32xf32>
    %35 = vector.broadcast %19 : vector<1x32xf32> to vector<128x32xf32>
    %36 = arith.addf %34, %35 : vector<128x32xf32>
    %37 = tpu.iota {dimensions = array<i32: 0>} : vector<64x128xi32>
    %c0_19 = arith.constant 0 : index
    %c0_20 = arith.constant 0 : index
    %38 = vector.load %arg3[%c0_19, %c0_20] : memref<1x128xi32, #tpu.memory_space<vmem>>, vector<1x128xi32>
    %39 = vector.broadcast %38 : vector<1x128xi32> to vector<64x128xi32>
    %40 = arith.cmpi eq, %37, %39 : vector<64x128xi32>
    %41 = arith.extui %40 : vector<64x128xi1> to vector<64x128xi32>
    %42 = arith.sitofp %41 : vector<64x128xi32> to vector<64x128xf32>
    %c0_21 = arith.constant 0 : index
    %c0_22 = arith.constant 0 : index
    %43 = vector.load %arg12[%c0_21, %c0_22] : memref<64x32xf32, #tpu.memory_space<vmem>>, vector<64x32xf32>
    %cst_23 = arith.constant dense<0.000000e+00> : vector<64x32xf32>
    %44 = tpu.matmul %42, %36, %cst_23 {dimension_numbers = #tpu.dot_dimension_numbers<[1], [0], [0], [1], [0, 0, 1, 1], [], []>} : vector<64x128xf32>, vector<128x32xf32>, vector<64x32xf32> -> vector<64x32xf32>
    %45 = arith.addf %43, %44 : vector<64x32xf32>
    %c0_24 = arith.constant 0 : index
    %c0_25 = arith.constant 0 : index
    %46 = vector.load %arg12[%c0_24, %c0_25] : memref<64x32xf32, #tpu.memory_space<vmem>>, vector<64x32xf32>
    tpu.vector_store %arg12[%c0_24, %c0_25], %45 {strides = array<i32>} : memref<64x32xf32, #tpu.memory_space<vmem>>, vector<64x32xf32>,
    %c1_i32 = arith.constant 1 : i32
    %47 = arith.cmpi eq, %arg0, %c1_i32 : i32
    %48 = arith.extui %47 : i1 to i32
    %c0_i32_26 = arith.constant 0 : i32
    %49 = arith.cmpi ne, %48, %c0_i32_26 : i32
    scf.if %49 {
      %c0_27 = arith.constant 0 : index
      %c0_28 = arith.constant 0 : index
      %50 = vector.load %arg7[%c0_27, %c0_28] : memref<64x32xf32, #tpu.memory_space<vmem>>, vector<64x32xf32>
      %c0_29 = arith.constant 0 : index
      %c0_30 = arith.constant 0 : index
      %51 = vector.load %arg12[%c0_29, %c0_30] : memref<64x32xf32, #tpu.memory_space<vmem>>, vector<64x32xf32>
      %c0_31 = arith.constant 0 : index
      %c0_32 = arith.constant 0 : index
      %52 = vector.load %arg9[%c0_31, %c0_32] : memref<160x64xf32, #tpu.memory_space<vmem>>, vector<160x64xf32>
      %53 = vector.extract_strided_slice %52 {offsets = [0, 0], sizes = [32, 64], strides = [1, 1]} : vector<160x64xf32> to vector<32x64xf32>
      %54 = vector.extract_strided_slice %52 {offsets = [32, 0], sizes = [32, 64], strides = [1, 1]} : vector<160x64xf32> to vector<32x64xf32>
      %55 = vector.extract_strided_slice %52 {offsets = [64, 0], sizes = [64, 64], strides = [1, 1]} : vector<160x64xf32> to vector<64x64xf32>
      %56 = vector.extract_strided_slice %52 {offsets = [128, 0], sizes = [32, 32], strides = [1, 1]} : vector<160x64xf32> to vector<32x32xf32>
      %57 = vector.extract_strided_slice %15 {offsets = [1, 0], sizes = [1, 64], strides = [1, 1]} : vector<5x64xf32> to vector<1x64xf32>
      %58 = vector.extract_strided_slice %15 {offsets = [2, 0], sizes = [1, 64], strides = [1, 1]} : vector<5x64xf32> to vector<1x64xf32>
      %59 = vector.extract_strided_slice %15 {offsets = [3, 0], sizes = [1, 32], strides = [1, 1]} : vector<5x64xf32> to vector<1x32xf32>
      %60 = vector.extract_strided_slice %15 {offsets = [4, 0], sizes = [1, 32], strides = [1, 1]} : vector<5x64xf32> to vector<1x32xf32>
      %61 = vector.extract_strided_slice %15 {offsets = [4, 32], sizes = [1, 32], strides = [1, 1]} : vector<5x64xf32> to vector<1x32xf32>
      %cst_33 = arith.constant dense<0.000000e+00> : vector<64x64xf32>
      %62 = tpu.matmul %50, %53, %cst_33 {dimension_numbers = #tpu.dot_dimension_numbers<[1], [0], [0], [1], [0, 0, 1, 1], [], []>} : vector<64x32xf32>, vector<32x64xf32>, vector<64x64xf32> -> vector<64x64xf32>
      %cst_34 = arith.constant dense<0.000000e+00> : vector<64x64xf32>
      %63 = tpu.matmul %51, %54, %cst_34 {dimension_numbers = #tpu.dot_dimension_numbers<[1], [0], [0], [1], [0, 0, 1, 1], [], []>} : vector<64x32xf32>, vector<32x64xf32>, vector<64x64xf32> -> vector<64x64xf32>
      %64 = arith.addf %62, %63 : vector<64x64xf32>
      %65 = vector.broadcast %57 : vector<1x64xf32> to vector<64x64xf32>
      %66 = arith.addf %64, %65 : vector<64x64xf32>
      %cst_35 = arith.constant 0.000000e+00 : f32
      %67 = vector.broadcast %cst_35 : f32 to vector<64x64xf32>
      %68 = arith.maximumf %66, %67 : vector<64x64xf32>
      %cst_36 = arith.constant dense<0.000000e+00> : vector<64x64xf32>
      %69 = tpu.matmul %68, %55, %cst_36 {dimension_numbers = #tpu.dot_dimension_numbers<[1], [0], [0], [1], [0, 0, 1, 1], [], []>} : vector<64x64xf32>, vector<64x64xf32>, vector<64x64xf32> -> vector<64x64xf32>
      %70 = vector.broadcast %58 : vector<1x64xf32> to vector<64x64xf32>
      %71 = arith.addf %69, %70 : vector<64x64xf32>
      %72 = vector.extract_strided_slice %71 {offsets = [0, 0], sizes = [64, 32], strides = [1, 1]} : vector<64x64xf32> to vector<64x32xf32>
      %73 = arith.negf %72 : vector<64x32xf32>
      %74 = math.exp %73 : vector<64x32xf32>
      %cst_37 = arith.constant 1.000000e+00 : f32
      %75 = vector.broadcast %cst_37 : f32 to vector<64x32xf32>
      %76 = arith.addf %75, %74 : vector<64x32xf32>
      %77 = arith.divf %75, %76 : vector<64x32xf32>
      %78 = vector.extract_strided_slice %71 {offsets = [0, 32], sizes = [64, 32], strides = [1, 1]} : vector<64x64xf32> to vector<64x32xf32>
      %cst_38 = arith.constant 0.000000e+00 : f32
      %79 = vector.broadcast %cst_38 : f32 to vector<64x32xf32>
      %80 = arith.maximumf %78, %79 : vector<64x32xf32>
      %cst_39 = arith.constant dense<0.000000e+00> : vector<64x32xf32>
      %81 = tpu.matmul %80, %56, %cst_39 {dimension_numbers = #tpu.dot_dimension_numbers<[1], [0], [0], [1], [0, 0, 1, 1], [], []>} : vector<64x32xf32>, vector<32x32xf32>, vector<64x32xf32> -> vector<64x32xf32>
      %82 = vector.broadcast %59 : vector<1x32xf32> to vector<64x32xf32>
      %83 = arith.addf %81, %82 : vector<64x32xf32>
      %84 = arith.mulf %77, %83 : vector<64x32xf32>
      %cst_40 = arith.constant 1.000000e+00 : f32
      %85 = vector.broadcast %cst_40 : f32 to vector<64x32xf32>
      %86 = arith.subf %85, %77 : vector<64x32xf32>
      %87 = arith.mulf %86, %50 : vector<64x32xf32>
      %88 = arith.addf %84, %87 : vector<64x32xf32>
      %cst_41 = arith.constant dense<0.000000e+00> : vector<64xf32>
      %89 = vector.multi_reduction <add>, %88, %cst_41 [1] : vector<64x32xf32> to vector<64xf32>
      %90 = vector.shape_cast %89 : vector<64xf32> to vector<64x1xf32>
      %cst_42 = arith.constant 3.200000e+01 : f32
      %91 = vector.broadcast %cst_42 : f32 to vector<64x1xf32>
      %92 = arith.divf %90, %91 : vector<64x1xf32>
      %93 = vector.broadcast %92 : vector<64x1xf32> to vector<64x32xf32>
      %94 = arith.subf %88, %93 : vector<64x32xf32>
      %95 = arith.mulf %94, %94 : vector<64x32xf32>
      %cst_43 = arith.constant dense<0.000000e+00> : vector<64xf32>
      %96 = vector.multi_reduction <add>, %95, %cst_43 [1] : vector<64x32xf32> to vector<64xf32>
      %97 = vector.shape_cast %96 : vector<64xf32> to vector<64x1xf32>
      %cst_44 = arith.constant 3.200000e+01 : f32
      %98 = vector.broadcast %cst_44 : f32 to vector<64x1xf32>
      %99 = arith.divf %97, %98 : vector<64x1xf32>
      %100 = vector.broadcast %92 : vector<64x1xf32> to vector<64x32xf32>
      %101 = arith.subf %88, %100 : vector<64x32xf32>
      %cst_45 = arith.constant 9.99999974E-6 : f32
      %102 = vector.broadcast %cst_45 : f32 to vector<64x1xf32>
      %103 = arith.addf %99, %102 : vector<64x1xf32>
      %104 = math.rsqrt %103 : vector<64x1xf32>
      %105 = vector.broadcast %104 : vector<64x1xf32> to vector<64x32xf32>
      %106 = arith.mulf %101, %105 : vector<64x32xf32>
      %107 = vector.broadcast %60 : vector<1x32xf32> to vector<64x32xf32>
      %108 = arith.mulf %106, %107 : vector<64x32xf32>
      %109 = vector.broadcast %61 : vector<1x32xf32> to vector<64x32xf32>
      %110 = arith.addf %108, %109 : vector<64x32xf32>
      %c0_46 = arith.constant 0 : index
      %c0_47 = arith.constant 0 : index
      %111 = vector.load %arg11[%c0_46, %c0_47] : memref<64x32xf32, #tpu.memory_space<vmem>>, vector<64x32xf32>
      tpu.vector_store %arg11[%c0_46, %c0_47], %110 {strides = array<i32>} : memref<64x32xf32, #tpu.memory_space<vmem>>, vector<64x32xf32>,
    } else {
    }
    return
  }
  func.func @transform_0(%arg0: i32) -> (i32, i32) {
    %c0_i32 = arith.constant 0 : i32
    %c0_i32_0 = arith.constant 0 : i32
    return %arg0, %c0_i32 : i32, i32
  }
  func.func @transform_1(%arg0: i32) -> (i32, i32) {
    %c0_i32 = arith.constant 0 : i32
    %c0_i32_0 = arith.constant 0 : i32
    return %arg0, %c0_i32 : i32, i32
  }
  func.func @transform_2(%arg0: i32) -> (i32, i32) {
    %c0_i32 = arith.constant 0 : i32
    %c0_i32_0 = arith.constant 0 : i32
    return %c0_i32, %arg0 : i32, i32
  }
  func.func @transform_3(%arg0: i32) -> (i32, i32) {
    %c0_i32 = arith.constant 0 : i32
    %c0_i32_0 = arith.constant 0 : i32
    return %arg0, %c0_i32 : i32, i32
  }
  func.func @transform_4(%arg0: i32) -> (i32, i32) {
    %c0_i32 = arith.constant 0 : i32
    %c0_i32_0 = arith.constant 0 : i32
    %c0_i32_1 = arith.constant 0 : i32
    return %c0_i32, %c0_i32_0 : i32, i32
  }
  func.func @transform_5(%arg0: i32) -> (i32, i32) {
    %c0_i32 = arith.constant 0 : i32
    %c0_i32_0 = arith.constant 0 : i32
    %c0_i32_1 = arith.constant 0 : i32
    return %c0_i32, %c0_i32_0 : i32, i32
  }
  func.func @transform_6(%arg0: i32) -> (i32, i32) {
    %c0_i32 = arith.constant 0 : i32
    %c0_i32_0 = arith.constant 0 : i32
    %c0_i32_1 = arith.constant 0 : i32
    return %c0_i32, %c0_i32_0 : i32, i32
  }
  func.func @transform_7(%arg0: i32) -> (i32, i32) {
    %c0_i32 = arith.constant 0 : i32
    %c0_i32_0 = arith.constant 0 : i32
    %c0_i32_1 = arith.constant 0 : i32
    return %c0_i32, %c0_i32_0 : i32, i32
  }
  func.func @transform_8(%arg0: i32) -> (i32, i32) {
    %c0_i32 = arith.constant 0 : i32
    %c0_i32_0 = arith.constant 0 : i32
    %c0_i32_1 = arith.constant 0 : i32
    return %c0_i32, %c0_i32_0 : i32, i32
  }
  func.func @transform_9(%arg0: i32) -> (i32, i32) {
    %c0_i32 = arith.constant 0 : i32
    %c0_i32_0 = arith.constant 0 : i32
    %c0_i32_1 = arith.constant 0 : i32
    return %c0_i32, %c0_i32_0 : i32, i32
  }
  func.func @transform_10(%arg0: i32) -> (i32, i32) {
    %c0_i32 = arith.constant 0 : i32
    %c0_i32_0 = arith.constant 0 : i32
    %c0_i32_1 = arith.constant 0 : i32
    return %c0_i32, %c0_i32_0 : i32, i32
  }
}

</mosaic_0001>

<bundles_post_ra>
// kernel: tpu_custom_call.1
= control target key start
LH: loop header
LB: loop body
LE: loop exit
PB: predicated region body
PF: predicated region fallthrough
CT: control target
= control target key end

     0   :  { %s3464_s13 = smov 0   ;;  %s4083_s0 = inlined_call_operand.vmem [shape: s32[256,1], index: 0, kind: input, shape index: {}]   ;;  %s4084_s1 = inlined_call_operand.vmem [shape: s32[256,1], index: 1, kind: input, shape index: {}]   ;;  %s4085_s2 = inlined_call_operand.vmem [shape: s32[1,256], index: 2, kind: input, shape index: {}]   ;;  %s4086_s3 = inlined_call_operand.vmem [shape: f32[256,32], index: 3, kind: input, shape index: {}]   ;;  %s4087_s4 = inlined_call_operand.vmem [shape: f32[64,32], index: 4, kind: input, shape index: {}]   ;;  %s4088_s5 = inlined_call_operand.vmem [shape: f32[64,32], index: 5, kind: input, shape index: {}]   ;;  %s4089_s6 = inlined_call_operand.vmem [shape: f32[64,32], index: 6, kind: input, shape index: {}]   ;;  %s4090_s7 = inlined_call_operand.vmem [shape: f32[64,32], index: 7, kind: input, shape index: {}]   ;;  %s4091_s8 = inlined_call_operand.vmem [shape: f32[160,64], index: 8, kind: input, shape index: {}]   ;;  %s4092_s9 = inlined_call_operand.vmem [shape: f32[5,64], index: 9, kind: input, shape index: {}]   ;;  %s4093_s10 = inlined_call_operand.vmem [shape: f32[64,32], index: 10, kind: output, shape index: {}]  }
   0x1 LB: > { %s3470_s14 = sadd.s32 4294967295, %s3401_s13   ;;  %p2571_p0 = scmp.ge.s32.totalorder %s3401_s13, 1  ;;  %s3401_s13 = sphi %s3464_s13, %s20_s13  }
   0x2   : > { %p338_p1 = scmp.lt.s32.totalorder %s3401_s13, 3 }
   0x4   : > { %p339_p2 = pnand %p2571_p0, %p338_p1 }
   0x5   : > { %s2572_s15 = sshll.u32 (!%p339_p2), %s3470_s14, 4  ;;  %p396_p3 = scmp.lt.s32.totalorder (!%p339_p2), %s3470_s14, 1 }
   0x6   : > { %342 = sbr.rel (%p339_p2) target bundleno = 2218 (0x8aa), region = 60  ;;  %p385_p4 = scmp.lt.s32.totalorder (!%p339_p2), %s2572_s15, 31 }
   0x7   : > { %p2578_p5 = scmp.ne.s32.totalorder (!%p339_p2), %s3470_s14, 0 }
   0xd   : > { %s3477_s16 = scalar_select %p396_p3, %s3470_s14, 1 }
   0xe   : > { %s4095_s15 = smov (!%p385_p4, %s2572_s15), 31  ;;  %408 = sbr.rel (%p2578_p5) target bundleno = 21 (0x15), region = 64 }
   0xf   : > { %s398_s19 = scalar_lea.vmem %s4085_s2, %s3477_s16  ;;  %s2573_s20 = sshll.u32 %s4095_s15, 3  ;;  %vm409_vm0 = vcmask (!%p2578_p5), 261120   ;;  %v3403_v0 = vmov (!%p2578_p5), 0.0  }
  0x10   : > { %s3486_s23 = scalar_lea.vmem %s4083_s0, %s2573_s20  ;;  %s3491_s26 = scalar_lea.vmem %s4084_s1, %s2573_s20  ;;  %410 = vst.msk [vmem:[#allocation2] sm:$0xff] (!%p2578_p5), %vm409_vm0, %v3403_v0  ;;  %411 = vst.msk [vmem:[#allocation2 + $0x8] sm:$0xff] (!%p2578_p5), %vm409_vm0, %v3403_v0 }
  0x11   : > { %s3496_s29 = scalar_lea.vmem %s4086_s3, %s2573_s20  ;;  %412 = vst.msk [vmem:[#allocation2 + $0x10] sm:$0xff] (!%p2578_p5), %vm409_vm0, %v3403_v0  ;;  %413 = vst.msk [vmem:[#allocation2 + $0x18] sm:$0xff] (!%p2578_p5), %vm409_vm0, %v3403_v0 }
  0x12   : > { %414 = vst.msk [vmem:[#allocation2 + $0x20] sm:$0xff] (!%p2578_p5), %vm409_vm0, %v3403_v0  ;;  %415 = vst.msk [vmem:[#allocation2 + $0x28] sm:$0xff] (!%p2578_p5), %vm409_vm0, %v3403_v0 }
  0x13   : > { %416 = vst.msk [vmem:[#allocation2 + $0x30] sm:$0xff] (!%p2578_p5), %vm409_vm0, %v3403_v0  ;;  %417 = vst.msk [vmem:[#allocation2 + $0x38] sm:$0xff] (!%p2578_p5), %vm409_vm0, %v3403_v0 }
  0x15 PF: > { %v534_v1 = vld [vmem:[%s3491_s26 + $0x10] sm:$0xff]  ;;  %v532_v2 = vld [vmem:[%s3491_s26] sm:$0xff]  ;;  %v3404_v3 = vmov 0   ;;  %v535_v4 = vld [vmem:[%s3491_s26 + $0x18] sm:$0xff]  ;;  %v418_v55 = vlaneseq  ;;  %vm669_vm1 = vcmask 523264   ;;  %v3405_v59 = vmov 0.0  }
  0x16   : > { %3346 = vset.pattern.permute.xlu1 %v3404_v3  ;;  %3345 = vset.pattern.permute.xlu0 %v3404_v3  ;;  %v533_v5 = vld [vmem:[%s3491_s26 + $0x8] sm:$0xff]  ;;  %v536_v7 = vld [vmem:[%s3491_s26 + $0x20] sm:$0xff]  ;;  %v539_v8 = vld [vmem:[%s3491_s26 + $0x38] sm:$0xff]  ;;  %s3406_s20 = smov 96   ;;  %p2692_p6 = scmp.ne.s32.totalorder %s3470_s14, 1 }
  0x17   : > { %555 = vperm.xlu1 %3346, %v534_v1   ;;  %549 = vperm.xlu0 %3345, %v532_v2   ;;  %v537_v6 = vld [vmem:[%s3491_s26 + $0x28] sm:$0xff]  ;;  %v538_v9 = vld [vmem:[%s3491_s26 + $0x30] sm:$0xff]  ;;  %v661_v10 = vld [vmem:[%s4088_s5] sm:$0xff]  ;;  %v3585_v56 = vand.u32 127, %v418_v55  ;;  %s3408_s21 = smov (!%p2692_p6), 96  }
  0x18   : > { %v662_v11 = vld [vmem:[%s4088_s5 + $0x8] sm:$0xff]  ;;  %v663_v12 = vld [vmem:[%s4088_s5 + $0x10] sm:$0xff]  ;;  %v664_v13 = vld [vmem:[%s4088_s5 + $0x18] sm:$0xff] }
  0x19   : > { %v3175_v14 = vpack.c.bf16 %v662_v11, %v661_v10  ;;  %v3179_v15 = vpack.c.bf16 %v664_v13, %v663_v12  ;;  %v665_v16 = vld [vmem:[%s4088_s5 + $0x20] sm:$0xff]  ;;  %v666_v17 = vld [vmem:[%s4088_s5 + $0x28] sm:$0xff]  ;;  %v667_v21 = vld [vmem:[%s4088_s5 + $0x30] sm:$0xff] }
  0x1a   : > { %v541_v18 = vld [vmem:[%s3491_s26 + $0x48] sm:$0xff]  ;;  %v540_v19 = vld [vmem:[%s3491_s26 + $0x40] sm:$0xff]  ;;  %v3183_v20 = vpack.c.bf16 %v666_v17, %v665_v16  ;;  %v668_v22 = vld [vmem:[%s4088_s5 + $0x38] sm:$0xff] }
  0x1b   : > { %558 = vperm.xlu1 %3346, %v535_v4   ;;  %552 = vperm.xlu0 %3345, %v533_v5   ;;  %v543_v23 = vld [vmem:[%s3491_s26 + $0x58] sm:$0xff]  ;;  %v542_v24 = vld [vmem:[%s3491_s26 + $0x50] sm:$0xff]  ;;  %v3187_v25 = vpack.c.bf16 %v668_v22, %v667_v21  ;;  %v653_v26 = vld [vmem:[%s4087_s4] sm:$0xff] }
  0x1c   : > { %3176 = vmatprep.subr.bf16.mxu0 %v3175_v14  ;;  %v654_v27 = vld [vmem:[%s4087_s4 + $0x8] sm:$0xff]  ;;  %v544_v29 = vld [vmem:[%s3491_s26 + $0x60] sm:$0xff]  ;;  %v547_v31 = vld [vmem:[%s3491_s26 + $0x78] sm:$0xff] }
  0x1d   : > { %3178 = vmatpush3.bf16.msra.mxu0 %v3175_v14  ;;  %v545_v28 = vld [vmem:[%s3491_s26 + $0x68] sm:$0xff]  ;;  %v3543_v30 = vpack.c.bf16 %v654_v27, %v653_v26  ;;  %v546_v32 = vld [vmem:[%s3491_s26 + $0x70] sm:$0xff]  ;;  %v420_v34 = vld [vmem:[%s3486_s23] sm:$0xff] }
  0x1e   : > { %3180 = vmatprep.subr.bf16.mxu0 %v3179_v15  ;;  %v421_v33 = vld [vmem:[%s3486_s23 + $0x8] sm:$0xff]  ;;  %v423_v35 = vld [vmem:[%s3486_s23 + $0x18] sm:$0xff]  ;;  %v422_v36 = vld [vmem:[%s3486_s23 + $0x10] sm:$0xff] }
  0x1f   : > { %564 = vperm.xlu1 %3346, %v537_v6   ;;  %561 = vperm.xlu0 %3345, %v536_v7   ;;  %v425_v37 = vld [vmem:[%s3486_s23 + $0x28] sm:$0xff]  ;;  %v424_v38 = vld [vmem:[%s3486_s23 + $0x20] sm:$0xff]  ;;  %v427_v39 = vld [vmem:[%s3486_s23 + $0x38] sm:$0xff] }
  0x20   : > { %v426_v40 = vld [vmem:[%s3486_s23 + $0x30] sm:$0xff]  ;;  %v429_v41 = vld [vmem:[%s3486_s23 + $0x48] sm:$0xff]  ;;  %v428_v42 = vld [vmem:[%s3486_s23 + $0x40] sm:$0xff] }
  0x21   : > { %3182 = vmatpush3.bf16.msra.mxu0 %v3179_v15  ;;  %v431_v43 = vld [vmem:[%s3486_s23 + $0x58] sm:$0xff]  ;;  %v430_v44 = vld [vmem:[%s3486_s23 + $0x50] sm:$0xff]  ;;  %v433_v45 = vld [vmem:[%s3486_s23 + $0x68] sm:$0xff] }
  0x22   : > { %3184 = vmatprep.subr.bf16.mxu0 %v3183_v20  ;;  %v432_v46 = vld [vmem:[%s3486_s23 + $0x60] sm:$0xff]  ;;  %v435_v47 = vld [vmem:[%s3486_s23 + $0x78] sm:$0xff]  ;;  %v434_v48 = vld [vmem:[%s3486_s23 + $0x70] sm:$0xff] }
  0x23   : > { %570 = vperm.xlu1 %3346, %v539_v8   ;;  %567 = vperm.xlu0 %3345, %v538_v9   ;;  %v644_v49 = vld [vmem:[%s4090_s7] sm:$0xff]  ;;  %v645_v50 = vld [vmem:[%s4090_s7 + $0x8] sm:$0xff]  ;;  %v646_v51 = vld [vmem:[%s4090_s7 + $0x10] sm:$0xff] }
  0x24   : > { %v3573_v52 = vpack.c.bf16 %v645_v50, %v644_v49  ;;  %v647_v53 = vld [vmem:[%s4090_s7 + $0x18] sm:$0xff]  ;;  %v655_v61 = vld [vmem:[%s4087_s4 + $0x10] sm:$0xff]  ;;  %v657_v4 = vld [vmem:[%s4087_s4 + $0x20] sm:$0xff] }
  0x25   : > { %3186 = vmatpush3.bf16.msra.mxu0 %v3183_v20  ;;  %v3578_v54 = vpack.c.bf16 %v647_v53, %v646_v51  ;;  %v656_v62 = vld [vmem:[%s4087_s4 + $0x18] sm:$0xff]  ;;  %v658_v5 = vld [vmem:[%s4087_s4 + $0x28] sm:$0xff]  ;;  %v659_v11 = vld [vmem:[%s4087_s4 + $0x30] sm:$0xff] }
  0x26   : > { %3188 = vmatprep.subr.bf16.mxu0 %v3187_v25  ;;  %3295 = vmatprep.subr.bf16.mxu1 %v3573_v52  ;;  %v3195_v2 = vpack.c.bf16 %v656_v62, %v655_v61  ;;  %v3199_v8 = vpack.c.bf16 %v658_v5, %v657_v4  ;;  %v660_v12 = vld [vmem:[%s4087_s4 + $0x38] sm:$0xff] }
  0x27   : > { %576 = vperm.xlu1 %3346, %v541_v18   ;;  %573 = vperm.xlu0 %3345, %v540_v19   ;;  %v3203_v15 = vpack.c.bf16 %v660_v12, %v659_v11 }
  0x28   : > { %3297 = vmatpush3.bf16.msra.mxu1 %v3573_v52 }
  0x29   : > { %3190 = vmatpush3.bf16.msra.mxu0 %v3187_v25  ;;  %3296 = vmatprep.subr.bf16.mxu1 %v3578_v54 }
  0x2a   : > { %3192 = vmatprep.subr.bf16.mxu0 %v3543_v30 }
  0x2b   : > { %582 = vperm.xlu1 %3346, %v543_v23   ;;  %579 = vperm.xlu0 %3345, %v542_v24  }
  0x2c   : > { %3298 = vmatpush3.bf16.msra.mxu1 %v3578_v54 }
  0x2f   : > { %588 = vperm.xlu1 %3346, %v545_v28   ;;  %585 = vperm.xlu0 %3345, %v544_v29  }
  0x33   : > { %594 = vperm.xlu1 %3346, %v547_v31   ;;  %591 = vperm.xlu0 %3345, %v546_v32  }
  0x37   : > { %440 = vperm.xlu1 %3346, %v421_v33   ;;  %437 = vperm.xlu0 %3345, %v420_v34  }
  0x3b   : > { %446 = vperm.xlu1 %3346, %v423_v35   ;;  %443 = vperm.xlu0 %3345, %v422_v36  }
  0x3f   : > { %452 = vperm.xlu1 %3346, %v425_v37   ;;  %449 = vperm.xlu0 %3345, %v424_v38  }
  0x43   : > { %458 = vperm.xlu1 %3346, %v427_v39   ;;  %455 = vperm.xlu0 %3345, %v426_v40  }
  0x47   : > { %464 = vperm.xlu1 %3346, %v429_v41   ;;  %461 = vperm.xlu0 %3345, %v428_v42  }
  0x4b   : > { %470 = vperm.xlu1 %3346, %v431_v43   ;;  %467 = vperm.xlu0 %3345, %v430_v44  }
  0x4f   : > { %476 = vperm.xlu1 %3346, %v433_v45   ;;  %473 = vperm.xlu0 %3345, %v432_v46  }
  0x53   : > { %482 = vperm.xlu1 %3346, %v435_v47   ;;  %479 = vperm.xlu0 %3345, %v434_v48  }
  0x96   : > { %v556_v57 = vpop.permute.xlu1 %555  ;;  %v550_v58 = vpop.permute.xlu0 %549 }
  0x97   : > { %vm596_vm2 = vcmp.eq.s32.totalorder %v550_v58, %v3585_v56  ;;  %vm598_vm3 = vcmp.eq.s32.totalorder %v556_v57, %v3585_v56 }
  0x98   : > { %v2595_v60 = vsel %vm596_vm2, 1.0, %v3405_v59  ;;  %v2597_v1 = vsel %vm598_vm3, 1.0, %v3405_v59 }
  0x99   : > { %2915 = vmatprep.mubr.msk.f32.mxu0 %vm669_vm1, %v2595_v60 }
  0x9a   : > { %v559_v63 = vpop.permute.xlu1 %558  ;;  %v553_v0 = vpop.permute.xlu0 %552 }
  0x9b   : > { %vm597_vm4 = vcmp.eq.s32.totalorder %v553_v0, %v3585_v56  ;;  %vm599_vm5 = vcmp.eq.s32.totalorder %v559_v63, %v3585_v56 }
  0x9c   : > { %v2596_v3 = vsel %vm597_vm4, 1.0, %v3405_v59  ;;  %v2598_v9 = vsel %vm599_vm5, 1.0, %v3405_v59 }
  0x9d   : > { %2916 = vmatmul.mubr.msk.f32.vlgmr.msra.gmra.mrb[0].mxu0 %vm669_vm1, %v2596_v3 }
  0x9e   : > { %v565_v6 = vpop.permute.xlu1 %564  ;;  %v562_v7 = vpop.permute.xlu0 %561  ;;  %2918 = vmatprep.mubr.msk.f32.mxu0 %vm669_vm1, %v2597_v1  ;;  %3194 = vmatpush3.bf16.msra.mxu0 %v3543_v30 }
  0x9f   : > { %vm600_vm6 = vcmp.eq.s32.totalorder %v562_v7, %v3585_v56  ;;  %3196 = vmatprep.subr.bf16.mxu0 %v3195_v2  ;;  %vm601_vm7 = vcmp.eq.s32.totalorder %v565_v6, %v3585_v56  ;;  %v648_v6 = vld [vmem:[%s4090_s7 + $0x20] sm:$0xff] }
  0xa0   : > { %v2599_v10 = vsel %vm600_vm6, 1.0, %v3405_v59  ;;  %v2600_v16 = vsel %vm601_vm7, 1.0, %v3405_v59 }
  0xa1   : > { %2919 = vmatmul.mubr.msk.f32.gmra.mrb[2].mxu0 %vm669_vm1, %v2598_v9  ;;  %v1056_v9 = vld [vmem:[%s3496_s29] sm:$0xff] }
  0xa2   : > { %v571_v13 = vpop.permute.xlu1 %570  ;;  %v568_v14 = vpop.permute.xlu0 %567  ;;  %2921 = vmatprep.mubr.msk.f32.mxu0 %vm669_vm1, %v2599_v10  ;;  %3198 = vmatpush3.bf16.msra.mxu0 %v3195_v2 }
  0xa3   : > { %vm602_vm8 = vcmp.eq.s32.totalorder %v568_v14, %v3585_v56  ;;  %3200 = vmatprep.subr.bf16.mxu0 %v3199_v8  ;;  %vm603_vm9 = vcmp.eq.s32.totalorder %v571_v13, %v3585_v56  ;;  %v1059_v13 = vld [vmem:[%s3496_s29 + $0x18] sm:$0xff]  ;;  %v1058_v14 = vld [vmem:[%s3496_s29 + $0x10] sm:$0xff] }
  0xa4   : > { %v2601_v17 = vsel %vm602_vm8, 1.0, %v3405_v59  ;;  %v2602_v20 = vsel %vm603_vm9, 1.0, %v3405_v59 }
  0xa5   : > { %2922 = vmatmul.mubr.msk.f32.gmra.mrb[4].mxu0 %vm669_vm1, %v2600_v16 }
  0xa6   : > { %v577_v18 = vpop.permute.xlu1 %576  ;;  %v574_v19 = vpop.permute.xlu0 %573  ;;  %2924 = vmatprep.mubr.msk.f32.mxu0 %vm669_vm1, %v2601_v17  ;;  %3202 = vmatpush3.bf16.msra.mxu0 %v3199_v8  ;;  %v1057_v8 = vld [vmem:[%s3496_s29 + $0x8] sm:$0xff] }
  0xa7   : > { %vm604_vm10 = vcmp.eq.s32.totalorder %v574_v19, %v3585_v56  ;;  %3204 = vmatprep.subr.bf16.mxu0 %v3203_v15  ;;  %vm605_vm11 = vcmp.eq.s32.totalorder %v577_v18, %v3585_v56 }
  0xa8   : > { %v2603_v21 = vsel %vm604_vm10, 1.0, %v3405_v59  ;;  %v2604_v24 = vsel %vm605_vm11, 1.0, %v3405_v59 }
  0xa9   : > { %2925 = vmatmul.mubr.msk.f32.gmra.mrb[6].mxu0 %vm669_vm1, %v2602_v20 }
  0xaa   : > { %v583_v22 = vpop.permute.xlu1 %582  ;;  %v580_v23 = vpop.permute.xlu0 %579  ;;  %2927 = vmatprep.mubr.msk.f32.mxu0 %vm669_vm1, %v2603_v21  ;;  %3206 = vmatpush3.bf16.msra.mxu0 %v3203_v15  ;;  %v1061_v21 = vld [vmem:[%s3496_s29 + $0x28] sm:$0xff] }
  0xab   : > { %vm606_vm12 = vcmp.eq.s32.totalorder %v580_v23, %v3585_v56  ;;  %3208 = vmatprep.subr.bf16.mxu0 %v3573_v52  ;;  %vm607_vm13 = vcmp.eq.s32.totalorder %v583_v22, %v3585_v56  ;;  %v650_v22 = vld [vmem:[%s4090_s7 + $0x30] sm:$0xff]  ;;  %v651_v23 = vld [vmem:[%s4090_s7 + $0x38] sm:$0xff] }
  0xac   : > { %v2605_v25 = vsel %vm606_vm12, 1.0, %v3405_v59  ;;  %v2606_v28 = vsel %vm607_vm13, 1.0, %v3405_v59 }
  0xad   : > { %2928 = vmatmul.mubr.msk.f32.gmra.mrb[8].mxu0 %vm669_vm1, %v2604_v24  ;;  %v1060_v24 = vld [vmem:[%s3496_s29 + $0x20] sm:$0xff] }
  0xae   : > { %v589_v26 = vpop.permute.xlu1 %588  ;;  %v586_v27 = vpop.permute.xlu0 %585  ;;  %2930 = vmatprep.mubr.msk.f32.mxu0 %vm669_vm1, %v2605_v25 }
  0xaf   : > { %vm608_vm14 = vcmp.eq.s32.totalorder %v586_v27, %v3585_v56  ;;  %vm609_vm15 = vcmp.eq.s32.totalorder %v589_v26, %v3585_v56 }
  0xb0   : > { %v2607_v29 = vsel %vm608_vm14, 1.0, %v3405_v59  ;;  %v2608_v32 = vsel %vm609_vm15, 1.0, %v3405_v59 }
  0xb1   : > { %2931 = vmatmul.mubr.msk.f32.gmra.mrb[10].mxu0 %vm669_vm1, %v2606_v28 }
  0xb2   : > { %v595_v30 = vpop.permute.xlu1 %594  ;;  %v592_v31 = vpop.permute.xlu0 %591  ;;  %2933 = vmatprep.mubr.msk.f32.mxu0 %vm669_vm1, %v2607_v29 }
  0xb3   : > { %vm610_vm0 = vcmp.eq.s32.totalorder %v592_v31, %v3585_v56  ;;  %vm611_vm2 = vcmp.eq.s32.totalorder %v595_v30, %v3585_v56  ;;  %v3219_v30 = vpack.c.bf16 %v651_v23, %v650_v22 }
  0xb4   : > { %v2609_v33 = vsel %vm610_vm0, 1.0, %v3405_v59  ;;  %v2610_v36 = vsel %vm611_vm2, 1.0, %v3405_v59 }
  0xb5   : > { %2934 = vmatmul.mubr.msk.f32.gmra.mrb[12].mxu0 %vm669_vm1, %v2608_v32  ;;  %v1063_v32 = vld [vmem:[%s3496_s29 + $0x38] sm:$0xff] }
  0xb6   : > { %v441_v34 = vpop.permute.xlu1 %440  ;;  %v438_v35 = vpop.permute.xlu0 %437  ;;  %2936 = vmatprep.mubr.msk.f32.mxu0 %vm669_vm1, %v2609_v33  ;;  %v1062_v33 = vld [vmem:[%s3496_s29 + $0x30] sm:$0xff] }
  0xb7   : > { %vm484_vm3 = vcmp.eq.s32.totalorder %v438_v35, %v3585_v56  ;;  %vm485_vm4 = vcmp.eq.s32.totalorder %v441_v34, %v3585_v56 }
  0xb8   : > { %v2579_v37 = vsel %vm484_vm3, 1.0, %v3405_v59  ;;  %v2580_v40 = vsel %vm485_vm4, 1.0, %v3405_v59  ;;  %vm1108_vm4 = vcmask 261120  }
  0xb9   : > { %2937 = vmatmul.mubr.msk.f32.gmra.mrb[14].mxu0 %vm669_vm1, %v2610_v36 }
  0xba   : > { %v447_v38 = vpop.permute.xlu1 %446  ;;  %v444_v39 = vpop.permute.xlu0 %443  ;;  %2955 = vmatprep.mubr.msk.f32.mxu0 %vm669_vm1, %v2579_v37 }
  0xbb   : > { %vm486_vm5 = vcmp.eq.s32.totalorder %v444_v39, %v3585_v56  ;;  %vm487_vm6 = vcmp.eq.s32.totalorder %v447_v38, %v3585_v56 }
  0xbc   : > { %v2581_v41 = vsel %vm486_vm5, 1.0, %v3405_v59  ;;  %v2582_v44 = vsel %vm487_vm6, 1.0, %v3405_v59 }
  0xbd   : > { %2956 = vmatmul.mubr.msk.f32.vlgmr.msra.gmra.mrb[0].mxu0 %vm669_vm1, %v2580_v40  ;;  %v1065_v40 = vld [vmem:[%s3496_s29 + $0x48] sm:$0xff] }
  0xbe   : > { %v453_v42 = vpop.permute.xlu1 %452  ;;  %v450_v43 = vpop.permute.xlu0 %449  ;;  %2958 = vmatprep.mubr.msk.f32.mxu0 %vm669_vm1, %v2581_v41  ;;  %3210 = vmatpush3.bf16.msra.mxu0 %v3573_v52  ;;  %v1064_v41 = vld [vmem:[%s3496_s29 + $0x40] sm:$0xff] }
  0xbf   : > { %vm488_vm7 = vcmp.eq.s32.totalorder %v450_v43, %v3585_v56  ;;  %3212 = vmatprep.subr.bf16.mxu0 %v3578_v54  ;;  %vm489_vm8 = vcmp.eq.s32.totalorder %v453_v42, %v3585_v56 }
  0xc0   : > { %v2583_v45 = vsel %vm488_vm7, 1.0, %v3405_v59  ;;  %v2584_v48 = vsel %vm489_vm8, 1.0, %v3405_v59 }
  0xc1   : > { %2959 = vmatmul.mubr.msk.f32.gmra.mrb[2].mxu0 %vm669_vm1, %v2582_v44 }
  0xc2   : > { %v459_v46 = vpop.permute.xlu1 %458  ;;  %v456_v47 = vpop.permute.xlu0 %455  ;;  %2961 = vmatprep.mubr.msk.f32.mxu0 %vm669_vm1, %v2583_v45  ;;  %3214 = vmatpush3.bf16.msra.mxu0 %v3578_v54 }
  0xc3   : > { %vm490_vm9 = vcmp.eq.s32.totalorder %v456_v47, %v3585_v56  ;;  %vm491_vm10 = vcmp.eq.s32.totalorder %v459_v46, %v3585_v56 }
  0xc4   : > { %v2585_v49 = vsel %vm490_vm9, 1.0, %v3405_v59  ;;  %v2586_v52 = vsel %vm491_vm10, 1.0, %v3405_v59 }
  0xc5   : > { %2962 = vmatmul.mubr.msk.f32.gmra.mrb[4].mxu0 %vm669_vm1, %v2584_v48  ;;  %v1067_v48 = vld [vmem:[%s3496_s29 + $0x58] sm:$0xff] }
  0xc6   : > { %v465_v50 = vpop.permute.xlu1 %464  ;;  %v462_v51 = vpop.permute.xlu0 %461  ;;  %2964 = vmatprep.mubr.msk.f32.mxu0 %vm669_vm1, %v2585_v49  ;;  %v1066_v49 = vld [vmem:[%s3496_s29 + $0x50] sm:$0xff] }
  0xc7   : > { %vm492_vm11 = vcmp.eq.s32.totalorder %v462_v51, %v3585_v56  ;;  %vm493_vm12 = vcmp.eq.s32.totalorder %v465_v50, %v3585_v56 }
  0xc8   : > { %v2587_v53 = vsel %vm492_vm11, 1.0, %v3405_v59  ;;  %v2588_v58 = vsel %vm493_vm12, 1.0, %v3405_v59 }
  0xc9   : > { %2965 = vmatmul.mubr.msk.f32.gmra.mrb[6].mxu0 %vm669_vm1, %v2586_v52 }
  0xca   : > { %v471_v54 = vpop.permute.xlu1 %470  ;;  %v468_v57 = vpop.permute.xlu0 %467  ;;  %2967 = vmatprep.mubr.msk.f32.mxu0 %vm669_vm1, %v2587_v53 }
  0xcb   : > { %vm494_vm13 = vcmp.eq.s32.totalorder %v468_v57, %v3585_v56  ;;  %vm495_vm14 = vcmp.eq.s32.totalorder %v471_v54, %v3585_v56 }
  0xcc   : > { %v2589_v60 = vsel %vm494_vm13, 1.0, %v3405_v59  ;;  %v2590_v63 = vsel %vm495_vm14, 1.0, %v3405_v59 }
  0xcd   : > { %2968 = vmatmul.mubr.msk.f32.gmra.mrb[8].mxu0 %vm669_vm1, %v2588_v58  ;;  %v1069_v58 = vld [vmem:[%s3496_s29 + $0x68] sm:$0xff] }
  0xce   : > { %v477_v61 = vpop.permute.xlu1 %476  ;;  %v474_v62 = vpop.permute.xlu0 %473  ;;  %2970 = vmatprep.mubr.msk.f32.mxu0 %vm669_vm1, %v2589_v60  ;;  %v1068_v60 = vld [vmem:[%s3496_s29 + $0x60] sm:$0xff] }
  0xcf   : > { %vm496_vm15 = vcmp.eq.s32.totalorder %v474_v62, %v3585_v56  ;;  %vm497_vm0 = vcmp.eq.s32.totalorder %v477_v61, %v3585_v56 }
  0xd0   : > { %v2591_v0 = vsel %vm496_vm15, 1.0, %v3405_v59  ;;  %v2592_v3 = vsel %vm497_vm0, 1.0, %v3405_v59 }
  0xd1   : > { %2971 = vmatmul.mubr.msk.f32.gmra.mrb[10].mxu0 %vm669_vm1, %v2590_v63 }
  0xd2   : > { %v483_v1 = vpop.permute.xlu1 %482  ;;  %v480_v2 = vpop.permute.xlu0 %479  ;;  %2973 = vmatprep.mubr.msk.f32.mxu0 %vm669_vm1, %v2591_v0 }
  0xd3   : > { %vm499_vm2 = vcmp.eq.s32.totalorder %v483_v1, %v3585_v56  ;;  %vm498_vm3 = vcmp.eq.s32.totalorder %v480_v2, %v3585_v56  ;;  %v649_v56 = vld [vmem:[%s4090_s7 + $0x28] sm:$0xff] }
  0xd4   : > { %v2594_v4 = vsel %vm499_vm2, 1.0, %v3405_v59  ;;  %v2593_v5 = vsel %vm498_vm3, 1.0, %v3405_v59  ;;  %v3215_v7 = vpack.c.bf16 %v649_v56, %v648_v6 }
  0xd5   : > { %2974 = vmatmul.mubr.msk.f32.gmra.mrb[12].mxu0 %vm669_vm1, %v2592_v3  ;;  %v1071_v3 = vld [vmem:[%s3496_s29 + $0x78] sm:$0xff] }
  0xd6   : > { %2976 = vmatprep.mubr.msk.f32.mxu0 %vm669_vm1, %v2593_v5  ;;  %3216 = vmatprep.subr.bf16.mxu1 %v3215_v7 }
  0xd9   : > { %2977 = vmatmul.mubr.msk.f32.gmra.mrb[14].mxu0 %vm669_vm1, %v2594_v4  ;;  %v1070_v4 = vld [vmem:[%s3496_s29 + $0x70] sm:$0xff] }
 0x190   : > { %v2957_v59 = vpop.f32.mrb[0].mxu0 }
 0x191   : > { %v1073_v10 = vadd.f32 %v2957_v59, %v1057_v8  ;;  %v977_v11 = vpop.f32.mrb[1].mxu0 }
 0x192   : > { %v1072_v12 = vadd.f32 %v1056_v9, %v977_v11  ;;  %v3751_v11 = vshrl.u32 %v418_v55, 7 }
 0x193   : > { %v1089_v17 = vmax.f32 %v1073_v10, 0.0 }
 0x194   : > { %v1088_v15 = vmax.f32 %v1072_v12, 0.0  ;;  %v2960_v16 = vpop.f32.mrb[2].mxu0  ;;  %v1106_v12 = vsub.s32 0, %v3751_v11 }
 0x195   : > { %v1075_v18 = vadd.f32 %v2960_v16, %v1059_v13  ;;  %v987_v19 = vpop.f32.mrb[3].mxu0  ;;  %v3757_v13 = vld [vmem:[%s4092_s9] sm:$0x1f] }
 0x196   : > { %v1074_v20 = vadd.f32 %v1058_v14, %v987_v19  ;;  %2987 = vmatprep.mubr.msk.f32.mxu0 %vm1108_vm4, %v1088_v15  ;;  %v1107_v14 = vrot.slane %v3757_v13, %v1106_v12 }
 0x197   : > { %2988 = vmatmul.mubr.msk.f32.vlgmr.msra.gmra.mrb[16].mxu0 %vm1108_vm4, %v1089_v17  ;;  %v1091_v27 = vmax.f32 %v1075_v18, 0.0 }
 0x198   : > { %v1090_v25 = vmax.f32 %v1074_v20, 0.0  ;;  %v2963_v26 = vpop.f32.mrb[4].mxu0  ;;  %1319 = vrot.lane.b32.xlu0 %v1107_v14, %s3406_s20 }
 0x199   : > { %v1077_v28 = vadd.f32 %v2963_v26, %v1061_v21  ;;  %v997_v29 = vpop.f32.mrb[5].mxu0 }
 0x19a   : > { %v1076_v31 = vadd.f32 %v1060_v24, %v997_v29  ;;  %2990 = vmatprep.mubr.msk.f32.mxu1 %vm1108_vm4, %v1090_v25 }
 0x19b   : > { %2991 = vmatmul.mubr.msk.f32.vlgmr.msra.gmra.mrb[0].mxu1 %vm1108_vm4, %v1091_v27  ;;  %v1093_v36 = vmax.f32 %v1077_v28, 0.0 }
 0x19c   : > { %v1092_v34 = vmax.f32 %v1076_v31, 0.0  ;;  %v2966_v35 = vpop.f32.mrb[6].mxu0  ;;  %3218 = vmatpush3.bf16.msra.mxu1 %v3215_v7 }
 0x19d   : > { %v1079_v37 = vadd.f32 %v2966_v35, %v1063_v32  ;;  %v1007_v38 = vpop.f32.mrb[7].mxu0  ;;  %3220 = vmatprep.subr.bf16.mxu1 %v3219_v30 }
 0x19e   : > { %v1078_v39 = vadd.f32 %v1062_v33, %v1007_v38  ;;  %2993 = vmatprep.mubr.msk.f32.mxu1 %vm1108_vm4, %v1092_v34 }
 0x19f   : > { %2994 = vmatmul.mubr.msk.f32.gmra.mrb[2].mxu1 %vm1108_vm4, %v1093_v36  ;;  %v1095_v44 = vmax.f32 %v1079_v37, 0.0 }
 0x1a0   : > { %v1094_v42 = vmax.f32 %v1078_v39, 0.0  ;;  %v2969_v43 = vpop.f32.mrb[8].mxu0  ;;  %3222 = vmatpush3.bf16.msra.mxu1 %v3219_v30 }
 0x1a1   : > { %v1081_v45 = vadd.f32 %v2969_v43, %v1065_v40  ;;  %v1017_v46 = vpop.f32.mrb[9].mxu0 }
 0x1a2   : > { %v1080_v47 = vadd.f32 %v1064_v41, %v1017_v46  ;;  %2996 = vmatprep.mubr.msk.f32.mxu1 %vm1108_vm4, %v1094_v42 }
 0x1a3   : > { %2997 = vmatmul.mubr.msk.f32.gmra.mrb[4].mxu1 %vm1108_vm4, %v1095_v44  ;;  %v1097_v52 = vmax.f32 %v1081_v45, 0.0 }
 0x1a4   : > { %v1096_v50 = vmax.f32 %v1080_v47, 0.0  ;;  %v2972_v51 = vpop.f32.mrb[10].mxu0 }
 0x1a5   : > { %v1083_v53 = vadd.f32 %v2972_v51, %v1067_v48  ;;  %v1027_v54 = vpop.f32.mrb[11].mxu0 }
 0x1a6   : > { %v1082_v57 = vadd.f32 %v1066_v49, %v1027_v54  ;;  %2999 = vmatprep.mubr.msk.f32.mxu1 %vm1108_vm4, %v1096_v50 }
 0x1a7   : > { %3000 = vmatmul.mubr.msk.f32.gmra.mrb[6].mxu1 %vm1108_vm4, %v1097_v52  ;;  %v1099_v63 = vmax.f32 %v1083_v53, 0.0 }
 0x1a8   : > { %v1098_v61 = vmax.f32 %v1082_v57, 0.0  ;;  %v2975_v62 = vpop.f32.mrb[12].mxu0 }
 0x1a9   : > { %v1085_v0 = vadd.f32 %v2975_v62, %v1069_v58  ;;  %v1037_v1 = vpop.f32.mrb[13].mxu0 }
 0x1aa   : > { %v1084_v2 = vadd.f32 %v1068_v60, %v1037_v1  ;;  %3002 = vmatprep.mubr.msk.f32.mxu1 %vm1108_vm4, %v1098_v61  ;;  %v3781_v1 = vld [vmem:[%s398_s19] ss:$0 sm:$0xff] }
 0x1ab   : > { %3003 = vmatmul.mubr.msk.f32.gmra.mrb[8].mxu1 %vm1108_vm4, %v1099_v63  ;;  %v1101_v56 = vmax.f32 %v1085_v0, 0.0  ;;  %vm1529_vm5 = vcmp.eq.s32.totalorder %v3751_v11, %v3781_v1 }
 0x1ac   : > { %v1100_v5 = vmax.f32 %v1084_v2, 0.0  ;;  %v2978_v6 = vpop.f32.mrb[14].mxu0  ;;  %v3407_v2 = vmov 1.0  }
 0x1ad   : > { %v1087_v7 = vadd.f32 %v2978_v6, %v1071_v3  ;;  %v1047_v8 = vpop.f32.mrb[15].mxu0 }
 0x1ae   : > { %v1086_v9 = vadd.f32 %v1070_v4, %v1047_v8  ;;  %3005 = vmatprep.mubr.msk.f32.mxu1 %vm1108_vm4, %v1100_v5 }
 0x1af   : > { %3006 = vmatmul.mubr.msk.f32.gmra.mrb[10].mxu1 %vm1108_vm4, %v1101_v56  ;;  %v1103_v10 = vmax.f32 %v1087_v7, 0.0 }
 0x1b0   : > { %v1102_v59 = vmax.f32 %v1086_v9, 0.0 }
 0x1b2   : > { %3008 = vmatprep.mubr.msk.f32.mxu1 %vm1108_vm4, %v1102_v59 }
 0x1b3   : > { %3009 = vmatmul.mubr.msk.f32.gmra.mrb[12].mxu1 %vm1108_vm4, %v1103_v10 }
 0x20a   : > { %v1320_v3 = vpop.permute.xlu0 %1319 }
 0x26a   : > { %v2989_v15 = vpop.f32.mrb[16].mxu0 }
 0x26b   : > { %v1229_v16 = vadd.f32 %v2989_v15, %v1107_v14  ;;  %v1223_v17 = vpop.f32.mrb[17].mxu0 }
 0x26c   : > { %v1224_v18 = vadd.f32 %v1223_v17, %v1107_v14 }
 0x26d   : > { %v1303_v21 = vmax.f32 %v1229_v16, 0.0 }
 0x26e   : > { %v1302_v19 = vmax.f32 %v1224_v18, 0.0  ;;  %v2992_v20 = vpop.f32.mrb[0].mxu1 }
 0x26f   : > { %v1239_v55 = vadd.f32 %v2992_v20, %v1107_v14  ;;  %v1233_v22 = vpop.f32.mrb[1].mxu1 }
 0x270   : > { %v1234_v23 = vadd.f32 %v1233_v22, %v1107_v14  ;;  %3019 = vmatprep.mubr.msk.f32.mxu1 %vm1108_vm4, %v1302_v19 }
 0x271   : > { %3020 = vmatmul.mubr.msk.f32.vlgmr.msra.gmra.mrb[14].mxu1 %vm1108_vm4, %v1303_v21  ;;  %v1305_v26 = vmax.f32 %v1239_v55, 0.0 }
 0x272   : > { %v1304_v24 = vmax.f32 %v1234_v23, 0.0  ;;  %v2995_v25 = vpop.f32.mrb[2].mxu1 }
 0x273   : > { %v1249_v27 = vadd.f32 %v2995_v25, %v1107_v14  ;;  %v1243_v28 = vpop.f32.mrb[3].mxu1 }
 0x274   : > { %v1244_v29 = vadd.f32 %v1243_v28, %v1107_v14  ;;  %3022 = vmatprep.mubr.msk.f32.mxu1 %vm1108_vm4, %v1304_v24 }
 0x275   : > { %3023 = vmatmul.mubr.msk.f32.gmra.mrb[16].mxu1 %vm1108_vm4, %v1305_v26  ;;  %v1307_v32 = vmax.f32 %v1249_v27, 0.0 }
 0x276   : > { %v1306_v30 = vmax.f32 %v1244_v29, 0.0  ;;  %v2998_v31 = vpop.f32.mrb[4].mxu1 }
 0x277   : > { %v1259_v33 = vadd.f32 %v2998_v31, %v1107_v14  ;;  %v1253_v34 = vpop.f32.mrb[5].mxu1 }
 0x278   : > { %v1254_v35 = vadd.f32 %v1253_v34, %v1107_v14  ;;  %3025 = vmatprep.mubr.msk.f32.mxu1 %vm1108_vm4, %v1306_v30 }
 0x279   : > { %3026 = vmatmul.mubr.msk.f32.gmra.mrb[18].mxu1 %vm1108_vm4, %v1307_v32  ;;  %v1309_v38 = vmax.f32 %v1259_v33, 0.0 }
 0x27a   : > { %v1308_v36 = vmax.f32 %v1254_v35, 0.0  ;;  %v3001_v37 = vpop.f32.mrb[6].mxu1 }
 0x27b   : > { %v1269_v39 = vadd.f32 %v3001_v37, %v1107_v14  ;;  %v1263_v40 = vpop.f32.mrb[7].mxu1 }
 0x27c   : > { %v1264_v41 = vadd.f32 %v1263_v40, %v1107_v14  ;;  %3028 = vmatprep.mubr.msk.f32.mxu1 %vm1108_vm4, %v1308_v36 }
 0x27d   : > { %3029 = vmatmul.mubr.msk.f32.gmra.mrb[20].mxu1 %vm1108_vm4, %v1309_v38  ;;  %v1311_v44 = vmax.f32 %v1269_v39, 0.0 }
 0x27e   : > { %v1310_v42 = vmax.f32 %v1264_v41, 0.0  ;;  %v3004_v43 = vpop.f32.mrb[8].mxu1 }
 0x27f   : > { %v1279_v45 = vadd.f32 %v3004_v43, %v1107_v14  ;;  %v1273_v46 = vpop.f32.mrb[9].mxu1 }
 0x280   : > { %v1274_v47 = vadd.f32 %v1273_v46, %v1107_v14  ;;  %3031 = vmatprep.mubr.msk.f32.mxu1 %vm1108_vm4, %v1310_v42  ;;  %v1517_v42 = vadd.s32 8, %v3751_v11  ;;  %v1520_v46 = vadd.s32 32, %v3751_v11 }
 0x281   : > { %3032 = vmatmul.mubr.msk.f32.gmra.mrb[22].mxu1 %vm1108_vm4, %v1311_v44  ;;  %v1313_v50 = vmax.f32 %v1279_v45, 0.0  ;;  %v1518_v44 = vadd.s32 16, %v3751_v11  ;;  %v1519_v45 = vadd.s32 24, %v3751_v11 }
 0x282   : > { %v1312_v48 = vmax.f32 %v1274_v47, 0.0  ;;  %v3007_v49 = vpop.f32.mrb[10].mxu1  ;;  %vm1530_vm6 = vcmp.eq.s32.totalorder %v1517_v42, %v3781_v1  ;;  %v1521_v47 = vadd.s32 40, %v3751_v11  ;;  %vm1533_vm9 = vcmp.eq.s32.totalorder %v1520_v46, %v3781_v1  ;;  %v3876_v42 = vld [vmem:[%s4089_s6 + $0x8] sm:$0xff] (!%p2692_p6) }
 0x283   : > { %v1289_v51 = vadd.f32 %v3007_v49, %v1107_v14  ;;  %v1283_v52 = vpop.f32.mrb[11].mxu1  ;;  %vm1531_vm7 = vcmp.eq.s32.totalorder %v1518_v44, %v3781_v1  ;;  %vm1532_vm8 = vcmp.eq.s32.totalorder %v1519_v45, %v3781_v1  ;;  %v1523_v49 = vadd.s32 56, %v3751_v11  ;;  %v3890_v44 = vld [vmem:[%s4089_s6 + $0x18] sm:$0xff] (!%p2692_p6)  ;;  %v3895_v45 = vld [vmem:[%s4089_s6 + $0x20] sm:$0xff] (!%p2692_p6)  ;;  %v3904_v46 = vld [vmem:[%s4089_s6 + $0x28] sm:$0xff] (!%p2692_p6) }
 0x284   : > { %v1284_v53 = vadd.f32 %v1283_v52, %v1107_v14  ;;  %3034 = vmatprep.mubr.msk.f32.mxu1 %vm1108_vm4, %v1312_v48  ;;  %v1522_v48 = vadd.s32 48, %v3751_v11  ;;  %vm1534_vm10 = vcmp.eq.s32.totalorder %v1521_v47, %v3781_v1  ;;  %v3909_v47 = vld [vmem:[%s4089_s6 + $0x30] sm:$0xff] (!%p2692_p6) }
 0x285   : > { %3035 = vmatmul.mubr.msk.f32.gmra.mrb[24].mxu1 %vm1108_vm4, %v1313_v50  ;;  %v1315_v58 = vmax.f32 %v1289_v51, 0.0  ;;  %vm1536_vm12 = vcmp.eq.s32.totalorder %v1523_v49, %v3781_v1  ;;  %v1554_v50 = vld [vmem:[#allocation2 + $0x8] sm:$0xff]  ;;  %v1553_v51 = vld [vmem:[#allocation2] sm:$0xff]  ;;  %v1716_v49 = vld [vmem:[%s4091_s8 + $0x70] sm:$0xff] (!%p2692_p6) }
 0x286   : > { %v1314_v54 = vmax.f32 %v1284_v53, 0.0  ;;  %v3010_v57 = vpop.f32.mrb[12].mxu1  ;;  %vm1535_vm11 = vcmp.eq.s32.totalorder %v1522_v48, %v3781_v1  ;;  %v1557_v1 = vld [vmem:[#allocation2 + $0x20] sm:$0xff]  ;;  %v3918_v48 = vld [vmem:[%s4089_s6 + $0x38] sm:$0xff] (!%p2692_p6) }
 0x287   : > { %v1299_v60 = vadd.f32 %v3010_v57, %v1107_v14  ;;  %v1293_v61 = vpop.f32.mrb[13].mxu1 }
 0x288   : > { %v1294_v62 = vadd.f32 %v1293_v61, %v1107_v14  ;;  %3037 = vmatprep.mubr.msk.f32.mxu1 %vm1108_vm4, %v1314_v54 }
 0x289   : > { %3038 = vmatmul.mubr.msk.f32.gmra.mrb[26].mxu1 %vm1108_vm4, %v1315_v58  ;;  %v1317_v0 = vmax.f32 %v1299_v60, 0.0  ;;  %v1556_v58 = vld [vmem:[#allocation2 + $0x18] sm:$0xff]  ;;  %v1555_v60 = vld [vmem:[#allocation2 + $0x10] sm:$0xff] }
 0x28a   : > { %v1316_v63 = vmax.f32 %v1294_v62, 0.0 }
 0x28c   : > { %3040 = vmatprep.mubr.msk.f32.mxu1 %vm1108_vm4, %v1316_v63 }
 0x28d   : > { %3041 = vmatmul.mubr.msk.f32.gmra.mrb[28].mxu1 %vm1108_vm4, %v1317_v0 }
 0x28e   : > { %3075 = vmatprep.mubr.msk.f32.mxu1 %vm1529_vm5, %v3407_v2 }
 0x344   : > { %v3021_v4 = vpop.f32.mrb[14].mxu1 }
 0x345   : > { %v1442_v5 = vadd.f32 %v3021_v4, %v1320_v3  ;;  %v1436_v6 = vpop.f32.mrb[15].mxu1 }
 0x346   : > { %v1437_v56 = vadd.f32 %v1436_v6, %v1320_v3 }
 0x348   : > { %v3223_v7 = vpack.c.bf16 %v1442_v5, %v1437_v56  ;;  %v3024_v8 = vpop.f32.mrb[16].mxu1  ;;  %v1560_v56 = vld [vmem:[#allocation2 + $0x38] sm:$0xff] }
 0x349   : > { %v1452_v9 = vadd.f32 %v3024_v8, %v1320_v3  ;;  %v1446_v59 = vpop.f32.mrb[17].mxu1 }
 0x34a   : > { %v1447_v10 = vadd.f32 %v1446_v59, %v1320_v3  ;;  %3224 = vmatprep.subr.bf16.mxu1 %v3223_v7 }
 0x34b   : > { %3226 = vmatpush3.bf16.msra.mxu1 %v3223_v7  ;;  %v1559_v7 = vld [vmem:[#allocation2 + $0x30] sm:$0xff] }
 0x34c   : > { %v3227_v12 = vpack.c.bf16 %v1452_v9, %v1447_v10  ;;  %v3027_v14 = vpop.f32.mrb[18].mxu1 }
 0x34d   : > { %v1462_v15 = vadd.f32 %v3027_v14, %v1320_v3  ;;  %v1456_v16 = vpop.f32.mrb[19].mxu1  ;;  %v1707_v14 = vld [vmem:[%s4091_s8 + $0x28] sm:$0xff] (!%p2692_p6) }
 0x34e   : > { %v1457_v17 = vadd.f32 %v1456_v16, %v1320_v3  ;;  %3228 = vmatprep.subr.bf16.mxu1 %v3227_v12 }
 0x34f   : > { %3230 = vmatpush3.bf16.msra.mxu1 %v3227_v12  ;;  %v1706_v12 = vld [vmem:[%s4091_s8 + $0x20] sm:$0xff] (!%p2692_p6) }
 0x350   : > { %v3231_v18 = vpack.c.bf16 %v1462_v15, %v1457_v17  ;;  %v3030_v19 = vpop.f32.mrb[20].mxu1  ;;  %v1708_v15 = vld [vmem:[%s4091_s8 + $0x30] sm:$0xff] (!%p2692_p6)  ;;  %v3255_v16 = vpack.c.bf16 (!%p2692_p6), %v1707_v14, %v1706_v12  ;;  %v1709_v17 = vld [vmem:[%s4091_s8 + $0x38] sm:$0xff] (!%p2692_p6) }
 0x351   : > { %v1472_v20 = vadd.f32 %v3030_v19, %v1320_v3  ;;  %v1466_v21 = vpop.f32.mrb[21].mxu1  ;;  %v3259_v19 = vpack.c.bf16 (!%p2692_p6), %v1709_v17, %v1708_v15  ;;  %v1718_v17 = vld [vmem:[%s4091_s8 + $0x80] sm:$0xff] (!%p2692_p6) }
 0x352   : > { %v1467_v55 = vadd.f32 %v1466_v21, %v1320_v3  ;;  %3232 = vmatprep.subr.bf16.mxu1 %v3231_v18  ;;  %v1703_v21 = vld [vmem:[%s4091_s8 + $0x8] sm:$0xff] (!%p2692_p6)  ;;  %3256 = vmatprep.subr.bf16.mxu0 (!%p2692_p6), %v3255_v16 }
 0x353   : > { %3234 = vmatpush3.bf16.msra.mxu1 %v3231_v18  ;;  %3258 = vmatpush3.bf16.msra.mxu0 (!%p2692_p6), %v3255_v16 }
 0x354   : > { %v3235_v22 = vpack.c.bf16 %v1472_v20, %v1467_v55  ;;  %v3033_v23 = vpop.f32.mrb[22].mxu1  ;;  %v1702_v20 = vld [vmem:[%s4091_s8] sm:$0xff] (!%p2692_p6)  ;;  %3260 = vmatprep.subr.bf16.mxu0 (!%p2692_p6), %v3259_v19 }
 0x355   : > { %v1482_v24 = vadd.f32 %v3033_v23, %v1320_v3  ;;  %v1476_v25 = vpop.f32.mrb[23].mxu1  ;;  %v3263_v55 = vpack.c.bf16 (!%p2692_p6), %v1703_v21, %v1702_v20  ;;  %v1705_v23 = vld [vmem:[%s4091_s8 + $0x18] sm:$0xff] (!%p2692_p6) }
 0x356   : > { %v1477_v26 = vadd.f32 %v1476_v25, %v1320_v3  ;;  %3236 = vmatprep.subr.bf16.mxu1 %v3235_v22  ;;  %v1710_v25 = vld [vmem:[%s4091_s8 + $0x40] sm:$0xff] (!%p2692_p6)  ;;  %v1721_v21 = vld [vmem:[%s4091_s8 + $0x98] sm:$0xff] (!%p2692_p6) }
 0x357   : > { %3238 = vmatpush3.bf16.msra.mxu1 %v3235_v22  ;;  %v1704_v22 = vld [vmem:[%s4091_s8 + $0x10] sm:$0xff] (!%p2692_p6)  ;;  %3262 = vmatpush3.bf16.msra.mxu0 (!%p2692_p6), %v3259_v19 }
 0x358   : > { %v3239_v27 = vpack.c.bf16 %v1482_v24, %v1477_v26  ;;  %v3036_v28 = vpop.f32.mrb[24].mxu1  ;;  %v1711_v26 = vld [vmem:[%s4091_s8 + $0x48] sm:$0xff] (!%p2692_p6)  ;;  %3264 = vmatprep.subr.bf16.mxu0 (!%p2692_p6), %v3263_v55  ;;  %v1720_v19 = vld [vmem:[%s4091_s8 + $0x90] sm:$0xff] (!%p2692_p6) }
 0x359   : > { %v1492_v29 = vadd.f32 %v3036_v28, %v1320_v3  ;;  %v1486_v30 = vpop.f32.mrb[25].mxu1  ;;  %v3267_v28 = vpack.c.bf16 (!%p2692_p6), %v1705_v23, %v1704_v22  ;;  %v2002_v22 = vsub.s32 (!%p2692_p6), 2, %v3751_v11 }
 0x35a   : > { %v1487_v31 = vadd.f32 %v1486_v30, %v1320_v3  ;;  %3240 = vmatprep.subr.bf16.mxu1 %v3239_v27  ;;  %v1712_v30 = vld [vmem:[%s4091_s8 + $0x50] sm:$0xff] (!%p2692_p6) }
 0x35b   : > { %3242 = vmatpush3.bf16.msra.mxu1 %v3239_v27  ;;  %v2003_v23 = vrot.slane (!%p2692_p6), %v3757_v13, %v2002_v22 }
 0x35c   : > { %v3243_v32 = vpack.c.bf16 %v1492_v29, %v1487_v31  ;;  %v3039_v33 = vpop.f32.mrb[26].mxu1  ;;  %v3271_v29 = vpack.c.bf16 (!%p2692_p6), %v1711_v26, %v1710_v25  ;;  %v1713_v31 = vld [vmem:[%s4091_s8 + $0x58] sm:$0xff] (!%p2692_p6) }
 0x35d   : > { %v1502_v34 = vadd.f32 %v3039_v33, %v1320_v3  ;;  %v1496_v35 = vpop.f32.mrb[27].mxu1  ;;  %v3275_v33 = vpack.c.bf16 (!%p2692_p6), %v1713_v31, %v1712_v30 }
 0x35e   : > { %v1497_v36 = vadd.f32 %v1496_v35, %v1320_v3  ;;  %3244 = vmatprep.subr.bf16.mxu1 %v3243_v32  ;;  %v1714_v35 = vld [vmem:[%s4091_s8 + $0x60] sm:$0xff] (!%p2692_p6) }
 0x35f   : > { %3246 = vmatpush3.bf16.msra.mxu1 %v3243_v32 }
 0x360   : > { %v3247_v37 = vpack.c.bf16 %v1502_v34, %v1497_v36  ;;  %v3042_v38 = vpop.f32.mrb[28].mxu1  ;;  %v1715_v36 = vld [vmem:[%s4091_s8 + $0x68] sm:$0xff] (!%p2692_p6) }
 0x361   : > { %v1512_v39 = vadd.f32 %v3042_v38, %v1320_v3  ;;  %v1506_v40 = vpop.f32.mrb[29].mxu1  ;;  %v3279_v38 = vpack.c.bf16 (!%p2692_p6), %v1715_v36, %v1714_v35 }
 0x362   : > { %v1507_v41 = vadd.f32 %v1506_v40, %v1320_v3  ;;  %3248 = vmatprep.subr.bf16.mxu1 %v3247_v37  ;;  %v1558_v3 = vld [vmem:[#allocation2 + $0x28] sm:$0xff] }
 0x363   : > { %3250 = vmatpush3.bf16.msra.mxu1 %v3247_v37 }
 0x364   : > { %v3251_v43 = vpack.c.bf16 %v1512_v39, %v1507_v41  ;;  %v3868_v41 = vld [vmem:[%s4089_s6] sm:$0xff] (!%p2692_p6) }
 0x366   : > { %3252 = vmatprep.subr.bf16.mxu1 %v3251_v43 }
 0x367   : > { %3254 = vmatpush3.bf16.msra.mxu1 %v3251_v43  ;;  %v3881_v43 = vld [vmem:[%s4089_s6 + $0x10] sm:$0xff] (!%p2692_p6) }
 0x368   : > { %3315 = vmatprep.subr.bf16.mxu1 (!%p2692_p6), %v3271_v29 }
 0x36a   : > { %3076 = vmatmul.mubr.msk.f32.vlgmr.msra.gmra.mrb[30].mxu1 %vm1530_vm6, %v3407_v2 }
 0x36b   : > { %3078 = vmatprep.mubr.msk.f32.mxu1 %vm1531_vm7, %v3407_v2  ;;  %3319 = vmatpush3.bf16.msra.mxu1 (!%p2692_p6), %v3271_v29 }
 0x36c   : > { %3316 = vmatprep.subr.bf16.mxu1 (!%p2692_p6), %v3275_v33 }
 0x36e   : > { %3079 = vmatmul.mubr.msk.f32.gmra.mrb[32].mxu1 %vm1532_vm8, %v3407_v2 }
 0x36f   : > { %3081 = vmatprep.mubr.msk.f32.mxu1 %vm1533_vm9, %v3407_v2  ;;  %3320 = vmatpush3.bf16.msra.mxu1 (!%p2692_p6), %v3275_v33 }
 0x370   : > { %3317 = vmatprep.subr.bf16.mxu1 (!%p2692_p6), %v3279_v38 }
 0x372   : > { %3082 = vmatmul.mubr.msk.f32.gmra.mrb[34].mxu1 %vm1534_vm10, %v3407_v2 }
 0x373   : > { %3084 = vmatprep.mubr.msk.f32.mxu1 %vm1535_vm11, %v3407_v2  ;;  %3321 = vmatpush3.bf16.msra.mxu1 (!%p2692_p6), %v3279_v38 }
 0x376   : > { %3085 = vmatmul.mubr.msk.f32.gmra.mrb[36].mxu1 %vm1536_vm12, %v3407_v2 }
 0x43d   : > { %v3077_v52 = vpop.f32.mrb[30].mxu1 }
 0x43e   : > { %v1667_v53 = vadd.f32 %v3077_v52, %v1554_v50  ;;  %v1627_v54 = vpop.f32.mrb[31].mxu1  ;;  %v1717_v50 = vld [vmem:[%s4091_s8 + $0x78] sm:$0xff] (!%p2692_p6)  ;;  %v1982_v52 = vsub.s32 (!%p2692_p6), 1, %v3751_v11 }
 0x43f   : > { %v1666_v57 = vadd.f32 %v1627_v54, %v1553_v51  ;;  %v3283_v51 = vpack.c.bf16 (!%p2692_p6), %v1717_v50, %v1716_v49 }
 0x440   : > { %1675 = vst.msk [vmem:[#allocation2 + $0x8] sm:$0xff] %vm1108_vm4, %v1667_v53  ;;  %v1983_v53 = vrot.slane (!%p2692_p6), %v3757_v13, %v1982_v52 }
 0x441   : > { %1674 = vst.msk [vmem:[#allocation2] sm:$0xff] %vm1108_vm4, %v1666_v57  ;;  %v3080_v61 = vpop.f32.mrb[32].mxu1  ;;  %3318 = vmatprep.subr.bf16.mxu1 (!%p2692_p6), %v3283_v51 }
 0x442   : > { %v1669_v62 = vadd.f32 %v3080_v61, %v1556_v58  ;;  %v1637_v63 = vpop.f32.mrb[33].mxu1  ;;  %3322 = vmatpush3.bf16.msra.mxu1 (!%p2692_p6), %v3283_v51 }
 0x443   : > { %v1668_v0 = vadd.f32 %v1637_v63, %v1555_v60 }
 0x444   : > { %1677 = vst.msk [vmem:[#allocation2 + $0x18] sm:$0xff] %vm1108_vm4, %v1669_v62 }
 0x445   : > { %1676 = vst.msk [vmem:[#allocation2 + $0x10] sm:$0xff] %vm1108_vm4, %v1668_v0  ;;  %v3083_v2 = vpop.f32.mrb[34].mxu1 }
 0x446   : > { %v1671_v4 = vadd.f32 %v3083_v2, %v1558_v3  ;;  %v1647_v5 = vpop.f32.mrb[35].mxu1 }
 0x447   : > { %v1670_v6 = vadd.f32 %v1647_v5, %v1557_v1  ;;  %1685 = sbr.rel (%p2692_p6) target bundleno = 2218 (0x8aa), region = 68  ;;  %v1695_v24 = vld [vmem:[#allocation2 + $0x8] sm:$0xff] (!%p2692_p6) }
 0x448   : > { %1679 = vst.msk [vmem:[#allocation2 + $0x28] sm:$0xff] %vm1108_vm4, %v1671_v4  ;;  %v1694_v18 = vld [vmem:[#allocation2] sm:$0xff] (!%p2692_p6) }
 0x449   : > { %1678 = vst.msk [vmem:[#allocation2 + $0x20] sm:$0xff] %vm1108_vm4, %v1670_v6  ;;  %v3086_v8 = vpop.f32.mrb[36].mxu1  ;;  %3095 = vmatprep.mubr.msk.f32.mxu0 (!%p2692_p6), %vm1108_vm4, %v1694_v18  ;;  %v1719_v18 = vld [vmem:[%s4091_s8 + $0x88] sm:$0xff] (!%p2692_p6) }
 0x44a   : > { %v1673_v9 = vadd.f32 %v3086_v8, %v1560_v56  ;;  %v1657_v59 = vpop.f32.mrb[37].mxu1  ;;  %3096 = vmatmul.mubr.msk.f32.vlgmr.msra.gmra.mrb[0].mxu0 (!%p2692_p6), %vm1108_vm4, %v1695_v24  ;;  %v3287_v20 = vpack.c.bf16 (!%p2692_p6), %v1719_v18, %v1718_v17 }
 0x44b   : > { %v1672_v10 = vadd.f32 %v1657_v59, %v1559_v7  ;;  %3266 = vmatpush3.bf16.msra.mxu0 (!%p2692_p6), %v3263_v55  ;;  %v1697_v32 = vld [vmem:[#allocation2 + $0x18] sm:$0xff] (!%p2692_p6)  ;;  %v3291_v55 = vpack.c.bf16 (!%p2692_p6), %v1721_v21, %v1720_v19 }
 0x44c   : > { %1681 = vst.msk [vmem:[#allocation2 + $0x38] sm:$0xff] %vm1108_vm4, %v1673_v9  ;;  %v1696_v27 = vld [vmem:[#allocation2 + $0x10] sm:$0xff] (!%p2692_p6)  ;;  %3268 = vmatprep.subr.bf16.mxu0 (!%p2692_p6), %v3267_v28  ;;  %3288 = vmatprep.subr.bf16.mxu1 (!%p2692_p6), %v3287_v20 }
 0x44d   : > { %1680 = vst.msk [vmem:[#allocation2 + $0x30] sm:$0xff] %vm1108_vm4, %v1672_v10  ;;  %3098 = vmatprep.mubr.msk.f32.mxu0 (!%p2692_p6), %vm1108_vm4, %v1696_v27 }
 0x44e   : > { %3099 = vmatmul.mubr.msk.f32.gmra.mrb[2].mxu0 %vm1108_vm4, %v1697_v32 }
 0x44f   : > { %v1699_v37 = vld [vmem:[#allocation2 + $0x28] sm:$0xff]  ;;  %3270 = vmatpush3.bf16.msra.mxu0 %v3267_v28 }
 0x450   : > { %v1698_v34 = vld [vmem:[#allocation2 + $0x20] sm:$0xff]  ;;  %3272 = vmatprep.subr.bf16.mxu0 %v3271_v29 }
 0x451   : > { %3101 = vmatprep.mubr.msk.f32.mxu0 %vm1108_vm4, %v1698_v34 }
 0x452   : > { %3102 = vmatmul.mubr.msk.f32.gmra.mrb[4].mxu0 %vm1108_vm4, %v1699_v37 }
 0x453   : > { %v1701_v40 = vld [vmem:[#allocation2 + $0x38] sm:$0xff] }
 0x454   : > { %v1700_v39 = vld [vmem:[#allocation2 + $0x30] sm:$0xff] }
 0x455   : > { %3104 = vmatprep.mubr.msk.f32.mxu0 %vm1108_vm4, %v1700_v39 }
 0x456   : > { %3105 = vmatmul.mubr.msk.f32.gmra.mrb[6].mxu0 %vm1108_vm4, %v1701_v40 }
 0x457   : > { %3115 = vmatprep.mubr.msk.f32.mxu0 %vm1108_vm4, %v3868_v41 }
 0x45a   : > { %3116 = vmatmul.mubr.msk.f32.vlgmr.msra.gmra.mrb[0].mxu0 %vm1108_vm4, %v3876_v42 }
 0x45b   : > { %3118 = vmatprep.mubr.msk.f32.mxu0 %vm1108_vm4, %v3881_v43  ;;  %3274 = vmatpush3.bf16.msra.mxu0 %v3271_v29 }
 0x45c   : > { %3276 = vmatprep.subr.bf16.mxu0 %v3275_v33 }
 0x45e   : > { %3119 = vmatmul.mubr.msk.f32.gmra.mrb[2].mxu0 %vm1108_vm4, %v3890_v44 }
 0x45f   : > { %3121 = vmatprep.mubr.msk.f32.mxu0 %vm1108_vm4, %v3895_v45  ;;  %3278 = vmatpush3.bf16.msra.mxu0 %v3275_v33 }
 0x460   : > { %3280 = vmatprep.subr.bf16.mxu0 %v3279_v38 }
 0x462   : > { %3122 = vmatmul.mubr.msk.f32.gmra.mrb[4].mxu0 %vm1108_vm4, %v3904_v46 }
 0x463   : > { %3124 = vmatprep.mubr.msk.f32.mxu0 %vm1108_vm4, %v3909_v47  ;;  %3282 = vmatpush3.bf16.msra.mxu0 %v3279_v38 }
 0x464   : > { %3284 = vmatprep.subr.bf16.mxu0 %v3283_v51 }
 0x466   : > { %3125 = vmatmul.mubr.msk.f32.gmra.mrb[6].mxu0 %vm1108_vm4, %v3918_v48 }
 0x467   : > { %3286 = vmatpush3.bf16.msra.mxu0 %v3283_v51 }
 0x52d   : > { %v3117_v54 = vpop.f32.mrb[0].mxu0 }
 0x52e   : > { %v1985_v57 = vadd.f32 %v3117_v54, %v1983_v53  ;;  %v1941_v58 = vpop.f32.mrb[1].mxu0 }
 0x52f   : > { %v1984_v60 = vadd.f32 %v1983_v53, %v1941_v58 }
 0x530   : > { %v1993_v63 = vmax.f32 %v1985_v57, 0.0 }
 0x531   : > { %v1992_v61 = vmax.f32 %v1984_v60, 0.0  ;;  %v3120_v62 = vpop.f32.mrb[2].mxu0 }
 0x532   : > { %v1987_v0 = vadd.f32 %v3120_v62, %v1983_v53  ;;  %v1951_v3 = vpop.f32.mrb[3].mxu0 }
 0x533   : > { %3143 = vmatprep.mubr.msk.f32.mxu0 %vm669_vm1, %v1992_v61  ;;  %v1986_v1 = vadd.f32 %v1983_v53, %v1951_v3 }
 0x534   : > { %3144 = vmatmul.mubr.msk.f32.vlgmr.msra.gmra.mrb[8].mxu0 %vm669_vm1, %v1993_v63  ;;  %v1995_v5 = vmax.f32 %v1987_v0, 0.0 }
 0x535   : > { %v3123_v2 = vpop.f32.mrb[4].mxu0  ;;  %v1994_v4 = vmax.f32 %v1986_v1, 0.0 }
 0x536   : > { %v1989_v6 = vadd.f32 %v3123_v2, %v1983_v53  ;;  %v1961_v56 = vpop.f32.mrb[5].mxu0 }
 0x537   : > { %v1988_v7 = vadd.f32 %v1983_v53, %v1961_v56  ;;  %3146 = vmatprep.mubr.msk.f32.mxu1 %vm669_vm1, %v1994_v4 }
 0x538   : > { %3147 = vmatmul.mubr.msk.f32.vlgmr.msra.gmra.mrb[0].mxu1 %vm669_vm1, %v1995_v5  ;;  %v1997_v59 = vmax.f32 %v1989_v6, 0.0 }
 0x539   : > { %v1996_v8 = vmax.f32 %v1988_v7, 0.0  ;;  %v3126_v9 = vpop.f32.mrb[6].mxu0  ;;  %3290 = vmatpush3.bf16.msra.mxu1 %v3287_v20 }
 0x53a   : > { %v1991_v10 = vadd.f32 %v3126_v9, %v1983_v53  ;;  %v1971_v12 = vpop.f32.mrb[7].mxu0  ;;  %3292 = vmatprep.subr.bf16.mxu1 %v3291_v55 }
 0x53b   : > { %v1990_v14 = vadd.f32 %v1983_v53, %v1971_v12  ;;  %3149 = vmatprep.mubr.msk.f32.mxu1 %vm669_vm1, %v1996_v8 }
 0x53c   : > { %3150 = vmatmul.mubr.msk.f32.gmra.mrb[2].mxu1 %vm669_vm1, %v1997_v59  ;;  %v1999_v16 = vmax.f32 %v1991_v10, 0.0 }
 0x53d   : > { %v1998_v15 = vmax.f32 %v1990_v14, 0.0  ;;  %3294 = vmatpush3.bf16.msra.mxu1 %v3291_v55 }
 0x53f   : > { %3152 = vmatprep.mubr.msk.f32.mxu1 %vm669_vm1, %v1998_v15 }
 0x540   : > { %3153 = vmatmul.mubr.msk.f32.gmra.mrb[4].mxu1 %vm669_vm1, %v1999_v16 }
 0x607   : > { %v3145_v24 = vpop.f32.mrb[8].mxu0 }
 0x608   : > { %v2094_v25 = vpop.f32.mrb[9].mxu0  ;;  %v2100_v27 = vadd.f32 %v3145_v24, %v2003_v23  ;;  %v2191_v24 = vsub.s32 3, %v3751_v11 }
 0x609   : > { %v2095_v26 = vadd.f32 %v2094_v25, %v2003_v23 }
 0x60a   : > { %v2182_v32 = vmax.f32 %v2100_v27, 0.0  ;;  %v2718_v2 = vmul.f32 -1.442695, %v2100_v27 }
 0x60b   : > { %v3148_v28 = vpop.f32.mrb[0].mxu1  ;;  %v2181_v29 = vmax.f32 %v2095_v26, 0.0  ;;  %v2717_v4 = vmul.f32 -1.442695, %v2095_v26 }
 0x60c   : > { %v2104_v30 = vpop.f32.mrb[1].mxu1  ;;  %v2110_v33 = vadd.f32 %v3148_v28, %v2003_v23  ;;  %3347 = vpow2.f32 %v2718_v2 }
 0x60d   : > { %v2105_v31 = vadd.f32 %v2104_v30, %v2003_v23  ;;  %2201 = vrot.lane.b32.xlu0 %v2181_v29, %s3408_s21  ;;  %3349 = vpow2.f32 %v2717_v4  ;;  %v2192_v29 = vrot.slane %v3757_v13, %v2191_v24 }
 0x60e   : > { %v2184_v38 = vmax.f32 %v2110_v33, 0.0  ;;  %v2720_v5 = vmul.f32 -1.442695, %v2110_v33 }
 0x60f   : > { %v3151_v34 = vpop.f32.mrb[2].mxu1  ;;  %v2183_v35 = vmax.f32 %v2105_v31, 0.0  ;;  %v2719_v6 = vmul.f32 -1.442695, %v2105_v31 }
 0x610   : > { %v2114_v36 = vpop.f32.mrb[3].mxu1  ;;  %v2120_v39 = vadd.f32 %v3151_v34, %v2003_v23  ;;  %3351 = vpow2.f32 %v2720_v5 }
 0x611   : > { %v2115_v37 = vadd.f32 %v2114_v36, %v2003_v23  ;;  %2205 = vrot.lane.b32.xlu1 %v2183_v35, %s3408_s21  ;;  %2203 = vrot.lane.b32.xlu0 %v2182_v32, %s3408_s21  ;;  %3353 = vpow2.f32 %v2719_v6 }
 0x612   : > { %v2186_v52 = vmax.f32 %v2120_v39, 0.0  ;;  %v2722_v56 = vmul.f32 -1.442695, %v2120_v39 }
 0x613   : > { %v2185_v40 = vmax.f32 %v2115_v37, 0.0  ;;  %v3154_v49 = vpop.f32.mrb[4].mxu1  ;;  %v2721_v7 = vmul.f32 -1.442695, %v2115_v37 }
 0x614   : > { %v2124_v50 = vpop.f32.mrb[5].mxu1  ;;  %v2130_v53 = vadd.f32 %v3154_v49, %v2003_v23  ;;  %3355 = vpow2.f32 %v2722_v56 }
 0x615   : > { %v2125_v51 = vadd.f32 %v2124_v50, %v2003_v23  ;;  %2207 = vrot.lane.b32.xlu1 %v2184_v38, %s3408_s21  ;;  %2209 = vrot.lane.b32.xlu0 %v2185_v40, %s3408_s21  ;;  %3357 = vpow2.f32 %v2721_v7 }
 0x616   : > { %v2188_v57 = vmax.f32 %v2130_v53, 0.0  ;;  %v2724_v8 = vmul.f32 -1.442695, %v2130_v53  ;;  %v3348_v59 = vpop.eup %3347 }
 0x617   : > { %v2187_v54 = vmax.f32 %v2125_v51, 0.0  ;;  %v2723_v9 = vmul.f32 -1.442695, %v2125_v51  ;;  %v3350_v10 = vpop.eup %3349  ;;  %v2158_v12 = vadd.f32 1.0, %v3348_v59 }
 0x618   : > { %3359 = vpow2.f32 %v2724_v8  ;;  %v2157_v15 = vadd.f32 1.0, %v3350_v10 }
 0x619   : > { %2211 = vrot.lane.b32.xlu1 %v2186_v52, %s3408_s21  ;;  %2213 = vrot.lane.b32.xlu0 %v2187_v54, %s3408_s21  ;;  %3361 = vpow2.f32 %v2723_v9 }
 0x61a   : > { %v3352_v14 = vpop.eup %3351  ;;  %3363 = vrcp.f32 %v2158_v12 }
 0x61b   : > { %v3354_v16 = vpop.eup %3353  ;;  %v2160_v17 = vadd.f32 1.0, %v3352_v14  ;;  %3365 = vrcp.f32 %v2157_v15 }
 0x61c   : > { %v2159_v19 = vadd.f32 1.0, %v3354_v16 }
 0x61d   : > { %2215 = vrot.lane.b32.xlu1 %v2188_v57, %s3408_s21  ;;  %3367 = vrcp.f32 %v2160_v17 }
 0x61e   : > { %v3356_v18 = vpop.eup %3355  ;;  %3369 = vrcp.f32 %v2159_v19 }
 0x61f   : > { %v3358_v20 = vpop.eup %3357  ;;  %v2162_v21 = vadd.f32 1.0, %v3356_v18 }
 0x620   : > { %v2161_v22 = vadd.f32 1.0, %v3358_v20 }
 0x621   : > { %3371 = vrcp.f32 %v2162_v21 }
 0x622   : > { %v3360_v55 = vpop.eup %3359  ;;  %3373 = vrcp.f32 %v2161_v22 }
 0x623   : > { %v3362_v23 = vpop.eup %3361  ;;  %v2164_v25 = vadd.f32 1.0, %v3360_v55 }
 0x624   : > { %v2163_v26 = vadd.f32 1.0, %v3362_v23  ;;  %v3364_v27 = vpop.eup %3363 }
 0x625   : > { %v3366_v28 = vpop.eup %3365  ;;  %3375 = vrcp.f32 %v2164_v25  ;;  %v2347_v30 = vsub.f32 1.0, %v3364_v27 }
 0x626   : > { %3377 = vrcp.f32 %v2163_v26  ;;  %v2346_v33 = vsub.f32 1.0, %v3366_v28 }
 0x627   : > { %v3368_v31 = vpop.eup %3367  ;;  %v2355_v39 = vmul.f32 %v2347_v30, %v3876_v42 }
 0x628   : > { %v3370_v34 = vpop.eup %3369  ;;  %v2349_v40 = vsub.f32 1.0, %v3368_v31  ;;  %v2354_v52 = vmul.f32 %v2346_v33, %v3868_v41 }
 0x629   : > { %v2348_v53 = vsub.f32 1.0, %v3370_v34 }
 0x62b   : > { %v3372_v49 = vpop.eup %3371  ;;  %v2356_v6 = vmul.f32 %v2348_v53, %v3881_v43 }
 0x62c   : > { %v3374_v54 = vpop.eup %3373 }
 0x62d   : > { %v2350_v41 = vsub.f32 1.0, %v3374_v54 }
 0x62f   : > { %v3376_v42 = vpop.eup %3375  ;;  %v2358_v18 = vmul.f32 %v2350_v41, %v3895_v45 }
 0x630   : > { %v3378_v56 = vpop.eup %3377  ;;  %v2353_v15 = vsub.f32 1.0, %v3376_v42 }
 0x631   : > { %v2352_v19 = vsub.f32 1.0, %v3378_v56 }
 0x632   : > { %v2361_v24 = vmul.f32 %v2353_v15, %v3918_v48 }
 0x67f   : > { %v2202_v58 = vpop.permute.xlu0 %2201 }
 0x680   : > { %3163 = vmatprep.mubr.msk.f32.mxu1 %vm1108_vm4, %v2202_v58 }
 0x683   : > { %v2206_v60 = vpop.permute.xlu1 %2205  ;;  %v2204_v61 = vpop.permute.xlu0 %2203 }
 0x684   : > { %3164 = vmatmul.mubr.msk.f32.vlgmr.msra.gmra.mrb[6].mxu1 %vm1108_vm4, %v2204_v61 }
 0x685   : > { %3166 = vmatprep.mubr.msk.f32.mxu1 %vm1108_vm4, %v2206_v60 }
 0x687   : > { %v2208_v62 = vpop.permute.xlu1 %2207  ;;  %v2210_v63 = vpop.permute.xlu0 %2209 }
 0x688   : > { %3167 = vmatmul.mubr.msk.f32.gmra.mrb[8].mxu1 %vm1108_vm4, %v2208_v62 }
 0x689   : > { %3169 = vmatprep.mubr.msk.f32.mxu1 %vm1108_vm4, %v2210_v63 }
 0x68b   : > { %v2212_v0 = vpop.permute.xlu1 %2211  ;;  %v2214_v3 = vpop.permute.xlu0 %2213 }
 0x68c   : > { %3170 = vmatmul.mubr.msk.f32.gmra.mrb[10].mxu1 %vm1108_vm4, %v2212_v0 }
 0x68d   : > { %3172 = vmatprep.mubr.msk.f32.mxu1 %vm1108_vm4, %v2214_v3  ;;  %v2357_v3 = vmul.f32 %v2349_v40, %v3890_v44 }
 0x68f   : > { %v2216_v1 = vpop.permute.xlu1 %2215 }
 0x690   : > { %3173 = vmatmul.mubr.msk.f32.gmra.mrb[12].mxu1 %vm1108_vm4, %v2216_v1  ;;  %v2351_v1 = vsub.f32 1.0, %v3372_v49 }
 0x692   : > { %v2359_v14 = vmul.f32 %v2351_v1, %v3904_v46 }
 0x757   : > { %v3165_v32 = vpop.f32.mrb[6].mxu1 }
 0x758   : > { %v2305_v35 = vadd.f32 %v3165_v32, %v2192_v29  ;;  %v2299_v36 = vpop.f32.mrb[7].mxu1 }
 0x759   : > { %v2300_v37 = vadd.f32 %v2299_v36, %v2192_v29 }
 0x75a   : > { %v2339_v38 = vmul.f32 %v3364_v27, %v2305_v35  ;;  %v2360_v27 = vmul.f32 %v2352_v19, %v3909_v47 }
 0x75b   : > { %v2338_v50 = vmul.f32 %v3366_v28, %v2300_v37  ;;  %v3168_v51 = vpop.f32.mrb[8].mxu1 }
 0x75c   : > { %v2315_v57 = vadd.f32 %v3168_v51, %v2192_v29  ;;  %v2309_v58 = vpop.f32.mrb[9].mxu1  ;;  %v2363_v60 = vadd.f32 %v2355_v39, %v2339_v38 }
 0x75d   : > { %v2310_v61 = vadd.f32 %v2309_v58, %v2192_v29  ;;  %v2362_v62 = vadd.f32 %v2354_v52, %v2338_v50 }
 0x75e   : > { %v2341_v63 = vmul.f32 %v3368_v31, %v2315_v57  ;;  %v2373_v0 = vsel %vm1108_vm4, %v2363_v60, 0.0 }
 0x75f   : > { %v2340_v2 = vmul.f32 %v3370_v34, %v2310_v61  ;;  %2374 = vadd.xlane.f32.xlu1 %v2373_v0  ;;  %v3171_v4 = vpop.f32.mrb[10].mxu1  ;;  %v2370_v5 = vsel %vm1108_vm4, %v2362_v62, 0.0 }
 0x760   : > { %v2325_v7 = vadd.f32 %v3171_v4, %v2192_v29  ;;  %v2319_v8 = vpop.f32.mrb[11].mxu1  ;;  %2371 = vadd.xlane.f32.xlu0 %v2370_v5  ;;  %v2365_v9 = vadd.f32 %v2357_v3, %v2341_v63 }
 0x761   : > { %v2320_v59 = vadd.f32 %v2319_v8, %v2192_v29  ;;  %v2364_v10 = vadd.f32 %v2356_v6, %v2340_v2 }
 0x762   : > { %v2343_v12 = vmul.f32 %v3372_v49, %v2325_v7  ;;  %v2379_v44 = vsel %vm1108_vm4, %v2365_v9, 0.0 }
 0x763   : > { %v2342_v16 = vmul.f32 %v3374_v54, %v2320_v59  ;;  %v3174_v17 = vpop.f32.mrb[12].mxu1  ;;  %v2376_v46 = vsel %vm1108_vm4, %v2364_v10, 0.0 }
 0x764   : > { %v2335_v20 = vadd.f32 %v3174_v17, %v2192_v29  ;;  %2380 = vadd.xlane.f32.xlu0 %v2379_v44  ;;  %v2329_v43 = vpop.f32.mrb[13].mxu1  ;;  %v2367_v21 = vadd.f32 %v2359_v14, %v2343_v12  ;;  %v2477_v14 = vsub.s32 4, %v3751_v11 }
 0x765   : > { %v2330_v55 = vadd.f32 %v2329_v43, %v2192_v29  ;;  %v2366_v22 = vadd.f32 %v2358_v18, %v2342_v16 }
 0x766   : > { %v2345_v23 = vmul.f32 %v3376_v42, %v2335_v20  ;;  %v2385_v30 = vsel %vm1108_vm4, %v2367_v21, 0.0  ;;  %v4028_v15 = vrot.slane %v3757_v13, %v2477_v14 }
 0x767   : > { %v2344_v25 = vmul.f32 %v3378_v56, %v2330_v55  ;;  %v2382_v26 = vsel %vm1108_vm4, %v2366_v22, 0.0 }
 0x768   : > { %2383 = vadd.xlane.f32.xlu1 %v2382_v26  ;;  %2377 = vadd.xlane.f32.xlu0 %v2376_v46  ;;  %v2369_v45 = vadd.f32 %v2361_v24, %v2345_v23 }
 0x769   : > { %v2368_v28 = vadd.f32 %v2360_v27, %v2344_v25 }
 0x76a   : > { %v2391_v29 = vsel %vm1108_vm4, %v2369_v45, 0.0 }
 0x76b   : > { %v2388_v31 = vsel %vm1108_vm4, %v2368_v28, 0.0 }
 0x76c   : > { %2386 = vadd.xlane.f32.xlu0 %v2385_v30  ;;  %2389 = vadd.xlane.f32.xlu1 %v2388_v31 }
 0x770   : > { %2392 = vadd.xlane.f32.xlu0 %v2391_v29 }
 0x7ec   : > { %v2375_v48 = vpop.xlane.xlu1 %2374 }
 0x7ed   : > { %v2396_v32 = vmul.f32 0.03125, %v2375_v48  ;;  %v2372_v33 = vpop.xlane.xlu0 %2371 }
 0x7ee   : > { %v2395_v34 = vmul.f32 0.03125, %v2372_v33 }
 0x7ef   : > { %v3986_v35 = vsub.f32 %v2363_v60, %v2396_v32 }
 0x7f0   : > { %v3988_v47 = vsub.f32 %v2362_v62, %v2395_v34 }
 0x7f1   : > { %v2381_v36 = vpop.xlane.xlu0 %2380  ;;  %v2412_v37 = vmul.f32 %v3986_v35, %v3986_v35 }
 0x7f2   : > { %v2398_v38 = vmul.f32 0.03125, %v2381_v36  ;;  %v2411_v39 = vmul.f32 %v3988_v47, %v3988_v47 }
 0x7f3   : > { %v2422_v40 = vsel %vm1108_vm4, %v2412_v37, 0.0 }
 0x7f4   : > { %v3995_v49 = vsub.f32 %v2365_v9, %v2398_v38  ;;  %2423 = vadd.xlane.f32.xlu0 %v2422_v40  ;;  %v2419_v50 = vsel %vm1108_vm4, %v2411_v39, 0.0 }
 0x7f5   : > { %v2384_v51 = vpop.xlane.xlu1 %2383  ;;  %v2378_v52 = vpop.xlane.xlu0 %2377  ;;  %2420 = vadd.xlane.f32.xlu1 %v2419_v50 }
 0x7f6   : > { %v2399_v53 = vmul.f32 0.03125, %v2384_v51  ;;  %v2397_v54 = vmul.f32 0.03125, %v2378_v52  ;;  %v2414_v57 = vmul.f32 %v3995_v49, %v3995_v49 }
 0x7f8   : > { %v4000_v58 = vsub.f32 %v2366_v22, %v2399_v53  ;;  %v4002_v60 = vsub.f32 %v2364_v10, %v2397_v54  ;;  %v2428_v61 = vsel %vm1108_vm4, %v2414_v57, 0.0 }
 0x7f9   : > { %2429 = vadd.xlane.f32.xlu0 %v2428_v61  ;;  %v2387_v62 = vpop.xlane.xlu0 %2386  ;;  %v2390_v63 = vpop.xlane.xlu1 %2389 }
 0x7fa   : > { %v2400_v0 = vmul.f32 0.03125, %v2387_v62  ;;  %v2401_v3 = vmul.f32 0.03125, %v2390_v63  ;;  %v2413_v1 = vmul.f32 %v4002_v60, %v4002_v60  ;;  %v2415_v5 = vmul.f32 %v4000_v58, %v4000_v58 }
 0x7fc   : > { %v4007_v42 = vsub.f32 %v2367_v21, %v2400_v0  ;;  %v4009_v2 = vsub.f32 %v2368_v28, %v2401_v3  ;;  %v2425_v4 = vsel %vm1108_vm4, %v2413_v1, 0.0  ;;  %v2431_v9 = vsel %vm1108_vm4, %v2415_v5, 0.0 }
 0x7fd   : > { %v2393_v41 = vpop.xlane.xlu0 %2392  ;;  %2426 = vadd.xlane.f32.xlu1 %v2425_v4 }
 0x7fe   : > { %v2402_v6 = vmul.f32 0.03125, %v2393_v41  ;;  %v2416_v56 = vmul.f32 %v4007_v42, %v4007_v42  ;;  %v2417_v59 = vmul.f32 %v4009_v2, %v4009_v2 }
 0x800   : > { %v4016_v7 = vsub.f32 %v2369_v45, %v2402_v6  ;;  %v2434_v8 = vsel %vm1108_vm4, %v2416_v56, 0.0  ;;  %v2437_v44 = vsel %vm1108_vm4, %v2417_v59, 0.0 }
 0x801   : > { %2435 = vadd.xlane.f32.xlu0 %v2434_v8  ;;  %2432 = vadd.xlane.f32.xlu1 %v2431_v9 }
 0x802   : > { %v2418_v10 = vmul.f32 %v4016_v7, %v4016_v7 }
 0x804   : > { %v2440_v12 = vsel %vm1108_vm4, %v2418_v10, 0.0 }
 0x805   : > { %2441 = vadd.xlane.f32.xlu0 %v2440_v12  ;;  %2438 = vadd.xlane.f32.xlu1 %v2437_v44 }
 0x816   : > { %2488 = vrot.lane.b32.xlu1 %v4028_v15, %s3408_s21 }
 0x881   : > { %v2424_v16 = vpop.xlane.xlu0 %2423 }
 0x882   : > { %v2444_v17 = vmul.f32 0.03125, %v2424_v16  ;;  %v2421_v18 = vpop.xlane.xlu1 %2420 }
 0x883   : > { %v2443_v19 = vmul.f32 0.03125, %v2421_v18 }
 0x884   : > { %v2452_v20 = vadd.f32 1e-05, %v2444_v17 }
 0x885   : > { %v2451_v43 = vadd.f32 1e-05, %v2443_v19 }
 0x886   : > { %3379 = vrsqrt.f32 %v2452_v20  ;;  %v2430_v21 = vpop.xlane.xlu0 %2429 }
 0x887   : > { %3381 = vrsqrt.f32 %v2451_v43  ;;  %v2446_v55 = vmul.f32 0.03125, %v2430_v21 }
 0x889   : > { %v2454_v22 = vadd.f32 1e-05, %v2446_v55 }
 0x88a   : > { %v2427_v23 = vpop.xlane.xlu1 %2426 }
 0x88b   : > { %3383 = vrsqrt.f32 %v2454_v22  ;;  %v2445_v11 = vmul.f32 0.03125, %v2427_v23 }
 0x88d   : > { %v2453_v24 = vadd.f32 1e-05, %v2445_v11 }
 0x88e   : > { %v2436_v13 = vpop.xlane.xlu0 %2435  ;;  %v2433_v25 = vpop.xlane.xlu1 %2432 }
 0x88f   : > { %3385 = vrsqrt.f32 %v2453_v24  ;;  %v2448_v26 = vmul.f32 0.03125, %v2436_v13  ;;  %v2447_v46 = vmul.f32 0.03125, %v2433_v25 }
 0x890   : > { %v3380_v27 = vpop.eup %3379 }
 0x891   : > { %v3382_v45 = vpop.eup %3381  ;;  %v2468_v28 = vmul.f32 %v3380_v27, %v3986_v35  ;;  %v2456_v30 = vadd.f32 1e-05, %v2448_v26  ;;  %v2455_v31 = vadd.f32 1e-05, %v2447_v46 }
 0x892   : > { %v2467_v29 = vmul.f32 %v3382_v45, %v3988_v47  ;;  %v2442_v48 = vpop.xlane.xlu0 %2441  ;;  %v2439_v32 = vpop.xlane.xlu1 %2438 }
 0x893   : > { %3387 = vrsqrt.f32 %v2456_v30  ;;  %v2450_v33 = vmul.f32 0.03125, %v2442_v48  ;;  %v2449_v34 = vmul.f32 0.03125, %v2439_v32  ;;  %v2480_v38 = vmul.f32 %v4028_v15, %v2468_v28 }
 0x894   : > { %v2479_v36 = vmul.f32 %v4028_v15, %v2467_v29  ;;  %3389 = vrsqrt.f32 %v2455_v31 }
 0x895   : > { %v3384_v37 = vpop.eup %3383  ;;  %v2458_v39 = vadd.f32 1e-05, %v2450_v33  ;;  %v2457_v40 = vadd.f32 1e-05, %v2449_v34 }
 0x896   : > { %v2470_v50 = vmul.f32 %v3384_v37, %v3995_v49  ;;  %v2489_v35 = vpop.permute.xlu1 %2488 }
 0x897   : > { %3391 = vrsqrt.f32 %v2458_v39  ;;  %v2491_v51 = vadd.f32 %v2489_v35, %v2479_v36  ;;  %v2492_v52 = vadd.f32 %v2489_v35, %v2480_v38 }
 0x898   : > { %v2482_v47 = vmul.f32 %v4028_v15, %v2470_v50  ;;  %3393 = vrsqrt.f32 %v2457_v40 }
 0x899   : > { %v3386_v53 = vpop.eup %3385  ;;  %2499 = vst.msk [vmem:[%s4093_s10] sm:$0xff] %vm1108_vm4, %v2491_v51  ;;  %2500 = vst.msk [vmem:[%s4093_s10 + $0x8] sm:$0xff] %vm1108_vm4, %v2492_v52 }
 0x89a   : > { %v2469_v49 = vmul.f32 %v3386_v53, %v4002_v60  ;;  %v2494_v54 = vadd.f32 %v2489_v35, %v2482_v47 }
 0x89c   : > { %v2481_v57 = vmul.f32 %v4028_v15, %v2469_v49  ;;  %2502 = vst.msk [vmem:[%s4093_s10 + $0x18] sm:$0xff] %vm1108_vm4, %v2494_v54 }
 0x89d   : > { %v3388_v61 = vpop.eup %3387 }
 0x89e   : > { %v3390_v62 = vpop.eup %3389  ;;  %v2472_v63 = vmul.f32 %v3388_v61, %v4007_v42  ;;  %v2493_v0 = vadd.f32 %v2489_v35, %v2481_v57 }
 0x89f   : > { %v2471_v3 = vmul.f32 %v3390_v62, %v4000_v58 }
 0x8a0   : > { %v2484_v1 = vmul.f32 %v4028_v15, %v2472_v63  ;;  %2501 = vst.msk [vmem:[%s4093_s10 + $0x10] sm:$0xff] %vm1108_vm4, %v2493_v0 }
 0x8a1   : > { %v3392_v60 = vpop.eup %3391  ;;  %v2483_v4 = vmul.f32 %v4028_v15, %v2471_v3 }
 0x8a2   : > { %v3394_v5 = vpop.eup %3393  ;;  %v2474_v41 = vmul.f32 %v3392_v60, %v4016_v7  ;;  %v2496_v6 = vadd.f32 %v2489_v35, %v2484_v1 }
 0x8a3   : > { %v2473_v56 = vmul.f32 %v3394_v5, %v4009_v2  ;;  %v2495_v42 = vadd.f32 %v2489_v35, %v2483_v4 }
 0x8a4   : > { %v2486_v8 = vmul.f32 %v4028_v15, %v2474_v41  ;;  %2504 = vst.msk [vmem:[%s4093_s10 + $0x28] sm:$0xff] %vm1108_vm4, %v2496_v6 }
 0x8a5   : > { %v2485_v58 = vmul.f32 %v4028_v15, %v2473_v56  ;;  %2503 = vst.msk [vmem:[%s4093_s10 + $0x20] sm:$0xff] %vm1108_vm4, %v2495_v42 }
 0x8a6   : > { %v2498_v9 = vadd.f32 %v2489_v35, %v2486_v8 }
 0x8a7   : > { %v2497_v7 = vadd.f32 %v2489_v35, %v2485_v58 }
 0x8a8   : > { %2506 = vst.msk [vmem:[%s4093_s10 + $0x38] sm:$0xff] %vm1108_vm4, %v2498_v9 }
 0x8a9   : > { %2505 = vst.msk [vmem:[%s4093_s10 + $0x30] sm:$0xff] %vm1108_vm4, %v2497_v7 }
 0x8aa PF: > { %s20_s13 = sadd.s32 1, %s3401_s13  }
 0x8ab   : > { %p17_p7 = scmp.ge.s32.totalorder %s20_s13, 4  }
 0x8ad   :  { %19 = sbr.rel (!%p17_p7) target bundleno = 1 (0x1), region = 103 }

</bundles_post_ra>
